<compile_context>
chip_gen: v6e
topology: v6e:2x2x1
jax: 0.10.0
libtpu: 0.0.40
codegen_flags: <defaults>
</compile_context>

<pallas_src>
import jax
import jax.numpy as jnp
import numpy as np
from jax import lax
from jax.experimental import pallas as pl
from jax.experimental.pallas import tpu as pltpu

_LANES = 128            # lane width of every band / conv-output block
_C1, _C2 = 6, 16        # conv1 / conv2 output channels
_H1, _H2, _H3 = 32, 16, 8   # spatial size before pool1 / pool2 / after pool2


# ----------------------------------------------------------------------------
# Banded ("whole row" im2col) conv weights: one matmul per conv stage
# ----------------------------------------------------------------------------
def _banded_conv_weight(w_oihw, w_out):
    """[3*128, 2*128] banded matrix so a 3x3 SAME conv is a single matmul.

    Row index    : dy*128 + wc*Cin + ci     (wc = zero-padded input column)
    Column index : parity*128 + k*Cout + co (output column j = 2*k + parity)
    The two 128-lane halves of the matmul output are the even / odd conv
    columns, so the 2x1 max-pool along W is an elementwise max of the halves.
    """
    c_out, c_in, kh, kw = w_oihw.shape
    assert kh == 3 and kw == 3
    assert (w_out + 2) * c_in <= _LANES and (w_out // 2) * c_out <= _LANES
    rows, cols, src = [], [], []
    for dy in range(kh):
        for j in range(w_out):
            parity, k = j % 2, j // 2
            for dx in range(kw):
                wc = j + dx                     # padded input column used
                for ci in range(c_in):
                    for co in range(c_out):
                        rows.append(dy * _LANES + wc * c_in + ci)
                        cols.append(parity * _LANES + k * c_out + co)
                        src.append(((co * c_in + ci) * kh + dy) * kw + dx)
    bm = jnp.zeros((3 * _LANES, 2 * _LANES), jnp.float32)
    return bm.at[np.asarray(rows), np.asarray(cols)].set(
        w_oihw.reshape(-1)[np.asarray(src)])


# ----------------------------------------------------------------------------
# Fused kernel: conv1+pool -> conv2+pool -> fc1 -> fc2 -> fc3, per batch tile
# ----------------------------------------------------------------------------
def _simple_cnn_kernel(x_ref, w1_ref, b1_ref, w2_ref, b2_ref,
                       wf1_ref, bf1_ref, wf2_ref, bf2_ref, wf3_ref, bf3_ref,
                       o_ref, s1_ref, s2_ref, s3_ref):
    """
    x_ref : [TB, 34, 128]  zero-padded input rows, lane = col*3 + chan
    w1/w2 : [384, 256]     banded conv weights
    b1/b2 : [1, 128]       conv biases tiled per output lane
    wf*/bf*: fc weights / biases, 128-padded (fc1 rows pre-permuted)
    o_ref : [TB, 1, 128]   logits padded to 128 lanes (lane-dense store)
    s1    : [TB, 32, 128]  conv1 output before H-pool
    s2    : [TB, 18, 128]  zero-padded conv2 input, lane = col*6 + chan
    s3    : [TB, 16, 128]  conv2 output before H-pool, lane = col*16 + chan
    """
    tb = x_ref.shape[0]

    # ---- conv1: ONE banded matmul over whole padded rows -------------------
    lhs1 = jnp.concatenate(
        [x_ref[:, pl.ds(dy, _H1), :] for dy in range(3)], axis=-1)
    lhs1 = lhs1.reshape(tb * _H1, 3 * _LANES)
    y1 = jnp.dot(lhs1, w1_ref[...], preferred_element_type=jnp.float32)
    p1 = jnp.maximum(y1[:, :_LANES], y1[:, _LANES:])            # 2x1 W-pool
    p1 = jnp.maximum(p1 + b1_ref[...], 0.0)                     # bias + ReLU
    s1_ref[...] = p1.reshape(tb, _H1, _LANES)
    p1p = jnp.maximum(s1_ref[:, pl.ds(0, _H2, stride=2), :],    # 1x2 H-pool
                      s1_ref[:, pl.ds(1, _H2, stride=2), :])    # [TB,16,128]

    # ---- zero-padded conv2 input in VMEM (halo rows + pad lanes stay zero) --
    # Full re-zero is 3 vregs/image and keeps the kernel free of any
    # cross-step / cross-core scratch-init assumptions.
    s2_ref[...] = jnp.zeros(s2_ref.shape, jnp.float32)
    s2_ref[:, pl.ds(1, _H2), pl.ds(_C1, _H2 * _C1)] = p1p[:, :, :_H2 * _C1]

    # ---- conv2: ONE banded matmul -------------------------------------------
    lhs2 = jnp.concatenate(
        [s2_ref[:, pl.ds(dy, _H2), :] for dy in range(3)], axis=-1)
    lhs2 = lhs2.reshape(tb * _H2, 3 * _LANES)
    y2 = jnp.dot(lhs2, w2_ref[...], preferred_element_type=jnp.float32)
    p2 = jnp.maximum(y2[:, :_LANES], y2[:, _LANES:])            # 2x1 W-pool
    p2 = jnp.maximum(p2 + b2_ref[...], 0.0)                     # bias + ReLU
    s3_ref[...] = p2.reshape(tb, _H2, _LANES)

    # ---- 1x2 H-pool + NHWC flatten to lane-dense [TB, 1024] -----------------
    flat = jnp.concatenate(
        [jnp.maximum(s3_ref[:, 2 * hp, :], s3_ref[:, 2 * hp + 1, :])
         for hp in range(_H3)], axis=-1)

    # ---- fused MLP head ------------------------------------------------------
    h = jnp.maximum(jnp.dot(flat, wf1_ref[...],
                            preferred_element_type=jnp.float32) + bf1_ref[...],
                    0.0)
    h = jnp.maximum(jnp.dot(h, wf2_ref[...],
                            preferred_element_type=jnp.float32) + bf2_ref[...],
                    0.0)
    o_ref[:, 0, :] = (jnp.dot(h, wf3_ref[...],
                              preferred_element_type=jnp.float32)
                      + bf3_ref[...])


def _pick_batch_tile(b, cap):
    """Largest divisor of b that is <= cap (cap >= 1)."""
    t = max(1, min(b, cap))
    while b % t:
        t -= 1
    return t


def _fused_call(xr, w1b, b1t, w2b, b2t, wf1, bf1, wf2, bf2, wf3, bf3, tile_b):
    b = xr.shape[0]

    def const(a):
        return pl.BlockSpec(a.shape, lambda i: (0, 0))

    return pl.pallas_call(
        _simple_cnn_kernel,
        out_shape=jax.ShapeDtypeStruct((b, 1, _LANES), jnp.float32),
        grid=(b // tile_b,),
        in_specs=[
            pl.BlockSpec((tile_b, _H1 + 2, _LANES), lambda i: (i, 0, 0)),
            const(w1b), const(b1t), const(w2b), const(b2t),
            const(wf1), const(bf1), const(wf2), const(bf2),
            const(wf3), const(bf3),
        ],
        out_specs=pl.BlockSpec((tile_b, 1, _LANES), lambda i: (i, 0, 0)),
        scratch_shapes=[
            pltpu.VMEM((tile_b, _H1, _LANES), jnp.float32),
            pltpu.VMEM((tile_b, _H2 + 2, _LANES), jnp.float32),
            pltpu.VMEM((tile_b, _H2, _LANES), jnp.float32),
        ],
        compiler_params=pltpu.CompilerParams(
            dimension_semantics=("parallel",),
            vmem_limit_bytes=16 * 1024 * 1024),
    )(xr, w1b, b1t, w2b, b2t, wf1, bf1, wf2, bf2, wf3, bf3)


# ----------------------------------------------------------------------------
# Full SimpleCNN forward
# ----------------------------------------------------------------------------
@jax.jit
def simple_cnn_forward(x_nchw, params):
    b, c, h, w = x_nchw.shape
    assert (c, h, w) == (3, 32, 32), "fc1 = 16*8*8 implies 3x32x32 inputs"

    # Input: NHWC, pad=1 halo, fold (col, chan) into a 128-lane row.
    x = jnp.transpose(x_nchw, (0, 2, 3, 1))
    xp = jnp.pad(x, ((0, 0), (1, 1), (1, 1), (0, 0)))            # [B,34,34,3]
    xr = jnp.pad(xp.reshape(b, _H1 + 2, (_H1 + 2) * 3),
                 ((0, 0), (0, 0), (0, _LANES - (_H1 + 2) * 3)))  # [B,34,128]

    # Conv weights -> banded matmul form; biases tiled per output lane.
    w1b = _banded_conv_weight(params["w_conv1"], _H1)            # [384,256]
    w2b = _banded_conv_weight(params["w_conv2"], _H2)            # [384,256]
    b1t = jnp.pad(jnp.tile(params["b_conv1"], _H2),
                  (0, _LANES - _H2 * _C1)).reshape(1, _LANES)
    b2t = jnp.tile(params["b_conv2"], _H3).reshape(1, _LANES)

    # fc weights: rows permuted so the kernel's NHWC flatten matches torch's
    # NCHW x.view(-1, 16*8*8); all dims padded to 128 for lane-dense matmuls.
    perm = np.transpose(np.arange(16 * 8 * 8).reshape(16, 8, 8),
                        (1, 2, 0)).reshape(-1)
    wf1 = jnp.pad(params["w_fc1"][perm], ((0, 0), (0, 8)))       # [1024,128]
    bf1 = jnp.pad(params["b_fc1"], (0, 8)).reshape(1, _LANES)
    wf2 = jnp.pad(params["w_fc2"], ((0, 8), (0, 44)))            # [128,128]
    bf2 = jnp.pad(params["b_fc2"], (0, 44)).reshape(1, _LANES)
    wf3 = jnp.pad(params["w_fc3"], ((0, 44), (0, 118)))          # [128,128]
    bf3 = jnp.pad(params["b_fc3"], (0, 118)).reshape(1, _LANES)

    # >=2 grid steps keep both v7x TensorCores busy; cap 8 bounds the VMEM
    # footprint (~7 MiB at tile_b=8).  v5e/v6e (128 MiB VMEM) can raise both.
    tile_b = _pick_batch_tile(b, min(8, max(1, b // 2)))
    out = _fused_call(xr, w1b, b1t, w2b, b2t, wf1, bf1, wf2, bf2, wf3, bf3,
                      tile_b)
    return out[:, 0, :10]


# ----------------------------------------------------------------------------
# Params + pure-JAX reference (PyTorch semantics) for verification
# ----------------------------------------------------------------------------
def init_params(key):
    ks = jax.random.split(key, 10)

    def n(k, shape, scale):
        return scale * jax.random.normal(k, shape, dtype=jnp.float32)

    # conv weights in torch OIHW layout; fc weights stored as [in, out]
    return {
        "w_conv1": n(ks[0], (6, 3, 3, 3), 0.2),
        "b_conv1": n(ks[1], (6,), 0.1),
        "w_conv2": n(ks[2], (16, 6, 3, 3), 0.1),
        "b_conv2": n(ks[3], (16,), 0.1),
        "w_fc1": n(ks[4], (16 * 8 * 8, 120), 0.05),
        "b_fc1": n(ks[5], (120,), 0.05),
        "w_fc2": n(ks[6], (120, 84), 0.05),
        "b_fc2": n(ks[7], (84,), 0.05),
        "w_fc3": n(ks[8], (84, 10), 0.05),
        "b_fc3": n(ks[9], (10,), 0.05),
    }


def reference_forward(x_nchw, p):
    dn = ("NCHW", "OIHW", "NCHW")
    y = lax.conv_general_dilated(x_nchw, p["w_conv1"], (1, 1), "SAME",
                                 dimension_numbers=dn)
    y = jax.nn.relu(y + p["b_conv1"][None, :, None, None])
    y = lax.reduce_window(y, -jnp.inf, lax.max, (1, 1, 2, 2), (1, 1, 2, 2),
                          "VALID")
    y = lax.conv_general_dilated(y, p["w_conv2"], (1, 1), "SAME",
                                 dimension_numbers=dn)
    y = jax.nn.relu(y + p["b_conv2"][None, :, None, None])
    y = lax.reduce_window(y, -jnp.inf, lax.max, (1, 1, 2, 2), (1, 1, 2, 2),
                          "VALID")
    y = y.reshape(y.shape[0], -1)
    y = jax.nn.relu(y @ p["w_fc1"] + p["b_fc1"])
    y = jax.nn.relu(y @ p["w_fc2"] + p["b_fc2"])
    return y @ p["w_fc3"] + p["b_fc3"]


if __name__ == "__main__":
    key = jax.random.PRNGKey(0)
    pkey, xkey = jax.random.split(key)
    params = init_params(pkey)
    # fc1 expects 16*8*8 features after two 2x pools -> input must be 3x32x32
    x = jax.random.normal(xkey, (2, 3, 32, 32), dtype=jnp.float32)

    out = jax.block_until_ready(simple_cnn_forward(x, params))
    assert out.shape == (2, 10)

    ref = reference_forward(x, params)
    # Tolerance covers f32-via-MXU multi-pass vs XLA default-precision convs;
    # structural/layout bugs would show up as O(1) errors.
    np.testing.assert_allclose(np.asarray(out), np.asarray(ref),
                               rtol=2e-2, atol=2e-2)
    print("KERNEL_OK")
</pallas_src>

<mosaic_0001>
module attributes {stable_mosaic.version = 11 : i64} {
  func.func @_simple_cnn_kernel(%arg0: i32, %arg1: memref<1x34x128xf32, #tpu.memory_space<vmem>>, %arg2: memref<384x256xf32, #tpu.memory_space<vmem>>, %arg3: memref<1x128xf32, #tpu.memory_space<vmem>>, %arg4: memref<384x256xf32, #tpu.memory_space<vmem>>, %arg5: memref<1x128xf32, #tpu.memory_space<vmem>>, %arg6: memref<1024x128xf32, #tpu.memory_space<vmem>>, %arg7: memref<1x128xf32, #tpu.memory_space<vmem>>, %arg8: memref<128x128xf32, #tpu.memory_space<vmem>>, %arg9: memref<1x128xf32, #tpu.memory_space<vmem>>, %arg10: memref<128x128xf32, #tpu.memory_space<vmem>>, %arg11: memref<1x128xf32, #tpu.memory_space<vmem>>, %arg12: memref<1x1x128xf32, #tpu.memory_space<vmem>>, %arg13: memref<1x32x128xf32, #tpu.memory_space<vmem>>, %arg14: memref<1x18x128xf32, #tpu.memory_space<vmem>>, %arg15: memref<1x16x128xf32, #tpu.memory_space<vmem>>) attributes {dimension_semantics = [#tpu.dimension_semantics<parallel>], iteration_bounds = array<i64: 2>, scalar_prefetch = 0 : i64, scratch_operands = 3 : i64, tpu.core_type = #tpu.core_type<tc>, window_params = [{transform_indices = @transform_0, window_bounds = array<i64: 1, 34, 128>}, {pipeline_mode = #tpu.pipeline_mode<synchronous>, transform_indices = @transform_1, window_bounds = array<i64: 384, 256>}, {pipeline_mode = #tpu.pipeline_mode<synchronous>, transform_indices = @transform_2, window_bounds = array<i64: 1, 128>}, {pipeline_mode = #tpu.pipeline_mode<synchronous>, transform_indices = @transform_3, window_bounds = array<i64: 384, 256>}, {pipeline_mode = #tpu.pipeline_mode<synchronous>, transform_indices = @transform_4, window_bounds = array<i64: 1, 128>}, {pipeline_mode = #tpu.pipeline_mode<synchronous>, transform_indices = @transform_5, window_bounds = array<i64: 1024, 128>}, {pipeline_mode = #tpu.pipeline_mode<synchronous>, transform_indices = @transform_6, window_bounds = array<i64: 1, 128>}, {pipeline_mode = #tpu.pipeline_mode<synchronous>, transform_indices = @transform_7, window_bounds = array<i64: 128, 128>}, {pipeline_mode = #tpu.pipeline_mode<synchronous>, transform_indices = @transform_8, window_bounds = array<i64: 1, 128>}, {pipeline_mode = #tpu.pipeline_mode<synchronous>, transform_indices = @transform_9, window_bounds = array<i64: 128, 128>}, {pipeline_mode = #tpu.pipeline_mode<synchronous>, transform_indices = @transform_10, window_bounds = array<i64: 1, 128>}, {transform_indices = @transform_11, window_bounds = array<i64: 1, 1, 128>}]} {
    %c0 = arith.constant 0 : index
    %c0_0 = arith.constant 0 : index
    %c0_1 = arith.constant 0 : index
    %0 = vector.load %arg1[%c0, %c0_0, %c0_1] : memref<1x34x128xf32, #tpu.memory_space<vmem>>, vector<1x32x128xf32>
    %c0_2 = arith.constant 0 : index
    %c1 = arith.constant 1 : index
    %c0_3 = arith.constant 0 : index
    %1 = vector.load %arg1[%c0_2, %c1, %c0_3] : memref<1x34x128xf32, #tpu.memory_space<vmem>>, vector<1x32x128xf32>
    %c0_4 = arith.constant 0 : index
    %c2 = arith.constant 2 : index
    %c0_5 = arith.constant 0 : index
    %2 = vector.load %arg1[%c0_4, %c2, %c0_5] : memref<1x34x128xf32, #tpu.memory_space<vmem>>, vector<1x32x128xf32>
    %3 = tpu.concatenate %0, %1, %2 in 2 : vector<1x32x128xf32>, vector<1x32x128xf32>, vector<1x32x128xf32> -> vector<1x32x384xf32>
    %4 = vector.shape_cast %3 : vector<1x32x384xf32> to vector<32x384xf32>
    %c0_6 = arith.constant 0 : index
    %c0_7 = arith.constant 0 : index
    %5 = vector.load %arg2[%c0_6, %c0_7] : memref<384x256xf32, #tpu.memory_space<vmem>>, vector<384x256xf32>
    %cst = arith.constant dense<0.000000e+00> : vector<32x256xf32>
    %6 = tpu.matmul %4, %5, %cst {dimension_numbers = #tpu.dot_dimension_numbers<[1], [0], [0], [1], [0, 0, 1, 1], [], []>} : vector<32x384xf32>, vector<384x256xf32>, vector<32x256xf32> -> vector<32x256xf32>
    %7 = vector.extract_strided_slice %6 {offsets = [0, 0], sizes = [32, 128], strides = [1, 1]} : vector<32x256xf32> to vector<32x128xf32>
    %8 = vector.extract_strided_slice %6 {offsets = [0, 128], sizes = [32, 128], strides = [1, 1]} : vector<32x256xf32> to vector<32x128xf32>
    %9 = arith.maximumf %7, %8 : vector<32x128xf32>
    %c0_8 = arith.constant 0 : index
    %c0_9 = arith.constant 0 : index
    %10 = vector.load %arg3[%c0_8, %c0_9] : memref<1x128xf32, #tpu.memory_space<vmem>>, vector<1x128xf32>
    %11 = vector.broadcast %10 : vector<1x128xf32> to vector<32x128xf32>
    %12 = arith.addf %9, %11 : vector<32x128xf32>
    %cst_10 = arith.constant 0.000000e+00 : f32
    %13 = vector.broadcast %cst_10 : f32 to vector<32x128xf32>
    %14 = arith.maximumf %12, %13 : vector<32x128xf32>
    %15 = vector.shape_cast %14 : vector<32x128xf32> to vector<1x32x128xf32>
    %c0_11 = arith.constant 0 : index
    %c0_12 = arith.constant 0 : index
    %c0_13 = arith.constant 0 : index
    %16 = vector.load %arg13[%c0_11, %c0_12, %c0_13] : memref<1x32x128xf32, #tpu.memory_space<vmem>>, vector<1x32x128xf32>
    tpu.vector_store %arg13[%c0_11, %c0_12, %c0_13], %15 {strides = array<i32>} : memref<1x32x128xf32, #tpu.memory_space<vmem>>, vector<1x32x128xf32>,
    %c0_14 = arith.constant 0 : index
    %c0_15 = arith.constant 0 : index
    %c0_16 = arith.constant 0 : index
    %17 = tpu.strided_load %arg13[%c0_14, %c0_15, %c0_16] {strides = array<i32: 1, 2, 1>} : memref<1x32x128xf32, #tpu.memory_space<vmem>>, vector<1x16x128xf32>
    %c0_17 = arith.constant 0 : index
    %c1_18 = arith.constant 1 : index
    %c0_19 = arith.constant 0 : index
    %18 = tpu.strided_load %arg13[%c0_17, %c1_18, %c0_19] {strides = array<i32: 1, 2, 1>} : memref<1x32x128xf32, #tpu.memory_space<vmem>>, vector<1x16x128xf32>
    %19 = arith.maximumf %17, %18 : vector<1x16x128xf32>
    %cst_20 = arith.constant 0.000000e+00 : f32
    %20 = vector.broadcast %cst_20 : f32 to vector<1x18x128xf32>
    %c0_21 = arith.constant 0 : index
    %c0_22 = arith.constant 0 : index
    %c0_23 = arith.constant 0 : index
    %21 = vector.load %arg14[%c0_21, %c0_22, %c0_23] : memref<1x18x128xf32, #tpu.memory_space<vmem>>, vector<1x18x128xf32>
    tpu.vector_store %arg14[%c0_21, %c0_22, %c0_23], %20 {strides = array<i32>} : memref<1x18x128xf32, #tpu.memory_space<vmem>>, vector<1x18x128xf32>,
    %22 = vector.extract_strided_slice %19 {offsets = [0, 0, 0], sizes = [1, 16, 96], strides = [1, 1, 1]} : vector<1x16x128xf32> to vector<1x16x96xf32>
    %c0_24 = arith.constant 0 : index
    %c1_25 = arith.constant 1 : index
    %c6 = arith.constant 6 : index
    %23 = vector.load %arg14[%c0_24, %c1_25, %c6] : memref<1x18x128xf32, #tpu.memory_space<vmem>>, vector<1x16x96xf32>
    tpu.vector_store %arg14[%c0_24, %c1_25, %c6], %22 {strides = array<i32>} : memref<1x18x128xf32, #tpu.memory_space<vmem>>, vector<1x16x96xf32>,
    %c0_26 = arith.constant 0 : index
    %c0_27 = arith.constant 0 : index
    %c0_28 = arith.constant 0 : index
    %24 = vector.load %arg14[%c0_26, %c0_27, %c0_28] : memref<1x18x128xf32, #tpu.memory_space<vmem>>, vector<1x16x128xf32>
    %c0_29 = arith.constant 0 : index
    %c1_30 = arith.constant 1 : index
    %c0_31 = arith.constant 0 : index
    %25 = vector.load %arg14[%c0_29, %c1_30, %c0_31] : memref<1x18x128xf32, #tpu.memory_space<vmem>>, vector<1x16x128xf32>
    %c0_32 = arith.constant 0 : index
    %c2_33 = arith.constant 2 : index
    %c0_34 = arith.constant 0 : index
    %26 = vector.load %arg14[%c0_32, %c2_33, %c0_34] : memref<1x18x128xf32, #tpu.memory_space<vmem>>, vector<1x16x128xf32>
    %27 = tpu.concatenate %24, %25, %26 in 2 : vector<1x16x128xf32>, vector<1x16x128xf32>, vector<1x16x128xf32> -> vector<1x16x384xf32>
    %28 = vector.shape_cast %27 : vector<1x16x384xf32> to vector<16x384xf32>
    %c0_35 = arith.constant 0 : index
    %c0_36 = arith.constant 0 : index
    %29 = vector.load %arg4[%c0_35, %c0_36] : memref<384x256xf32, #tpu.memory_space<vmem>>, vector<384x256xf32>
    %cst_37 = arith.constant dense<0.000000e+00> : vector<16x256xf32>
    %30 = tpu.matmul %28, %29, %cst_37 {dimension_numbers = #tpu.dot_dimension_numbers<[1], [0], [0], [1], [0, 0, 1, 1], [], []>} : vector<16x384xf32>, vector<384x256xf32>, vector<16x256xf32> -> vector<16x256xf32>
    %31 = vector.extract_strided_slice %30 {offsets = [0, 0], sizes = [16, 128], strides = [1, 1]} : vector<16x256xf32> to vector<16x128xf32>
    %32 = vector.extract_strided_slice %30 {offsets = [0, 128], sizes = [16, 128], strides = [1, 1]} : vector<16x256xf32> to vector<16x128xf32>
    %33 = arith.maximumf %31, %32 : vector<16x128xf32>
    %c0_38 = arith.constant 0 : index
    %c0_39 = arith.constant 0 : index
    %34 = vector.load %arg5[%c0_38, %c0_39] : memref<1x128xf32, #tpu.memory_space<vmem>>, vector<1x128xf32>
    %35 = vector.broadcast %34 : vector<1x128xf32> to vector<16x128xf32>
    %36 = arith.addf %33, %35 : vector<16x128xf32>
    %cst_40 = arith.constant 0.000000e+00 : f32
    %37 = vector.broadcast %cst_40 : f32 to vector<16x128xf32>
    %38 = arith.maximumf %36, %37 : vector<16x128xf32>
    %39 = vector.shape_cast %38 : vector<16x128xf32> to vector<1x16x128xf32>
    %c0_41 = arith.constant 0 : index
    %c0_42 = arith.constant 0 : index
    %c0_43 = arith.constant 0 : index
    %40 = vector.load %arg15[%c0_41, %c0_42, %c0_43] : memref<1x16x128xf32, #tpu.memory_space<vmem>>, vector<1x16x128xf32>
    tpu.vector_store %arg15[%c0_41, %c0_42, %c0_43], %39 {strides = array<i32>} : memref<1x16x128xf32, #tpu.memory_space<vmem>>, vector<1x16x128xf32>,
    %c0_44 = arith.constant 0 : index
    %c0_45 = arith.constant 0 : index
    %c0_46 = arith.constant 0 : index
    %41 = vector.load %arg15[%c0_44, %c0_45, %c0_46] : memref<1x16x128xf32, #tpu.memory_space<vmem>>, vector<1x1x128xf32>
    %42 = vector.shape_cast %41 : vector<1x1x128xf32> to vector<1x128xf32>
    %c0_47 = arith.constant 0 : index
    %c1_48 = arith.constant 1 : index
    %c0_49 = arith.constant 0 : index
    %43 = vector.load %arg15[%c0_47, %c1_48, %c0_49] : memref<1x16x128xf32, #tpu.memory_space<vmem>>, vector<1x1x128xf32>
    %44 = vector.shape_cast %43 : vector<1x1x128xf32> to vector<1x128xf32>
    %45 = arith.maximumf %42, %44 : vector<1x128xf32>
    %c0_50 = arith.constant 0 : index
    %c2_51 = arith.constant 2 : index
    %c0_52 = arith.constant 0 : index
    %46 = vector.load %arg15[%c0_50, %c2_51, %c0_52] : memref<1x16x128xf32, #tpu.memory_space<vmem>>, vector<1x1x128xf32>
    %47 = vector.shape_cast %46 : vector<1x1x128xf32> to vector<1x128xf32>
    %c0_53 = arith.constant 0 : index
    %c3 = arith.constant 3 : index
    %c0_54 = arith.constant 0 : index
    %48 = vector.load %arg15[%c0_53, %c3, %c0_54] : memref<1x16x128xf32, #tpu.memory_space<vmem>>, vector<1x1x128xf32>
    %49 = vector.shape_cast %48 : vector<1x1x128xf32> to vector<1x128xf32>
    %50 = arith.maximumf %47, %49 : vector<1x128xf32>
    %c0_55 = arith.constant 0 : index
    %c4 = arith.constant 4 : index
    %c0_56 = arith.constant 0 : index
    %51 = vector.load %arg15[%c0_55, %c4, %c0_56] : memref<1x16x128xf32, #tpu.memory_space<vmem>>, vector<1x1x128xf32>
    %52 = vector.shape_cast %51 : vector<1x1x128xf32> to vector<1x128xf32>
    %c0_57 = arith.constant 0 : index
    %c5 = arith.constant 5 : index
    %c0_58 = arith.constant 0 : index
    %53 = vector.load %arg15[%c0_57, %c5, %c0_58] : memref<1x16x128xf32, #tpu.memory_space<vmem>>, vector<1x1x128xf32>
    %54 = vector.shape_cast %53 : vector<1x1x128xf32> to vector<1x128xf32>
    %55 = arith.maximumf %52, %54 : vector<1x128xf32>
    %c0_59 = arith.constant 0 : index
    %c6_60 = arith.constant 6 : index
    %c0_61 = arith.constant 0 : index
    %56 = vector.load %arg15[%c0_59, %c6_60, %c0_61] : memref<1x16x128xf32, #tpu.memory_space<vmem>>, vector<1x1x128xf32>
    %57 = vector.shape_cast %56 : vector<1x1x128xf32> to vector<1x128xf32>
    %c0_62 = arith.constant 0 : index
    %c7 = arith.constant 7 : index
    %c0_63 = arith.constant 0 : index
    %58 = vector.load %arg15[%c0_62, %c7, %c0_63] : memref<1x16x128xf32, #tpu.memory_space<vmem>>, vector<1x1x128xf32>
    %59 = vector.shape_cast %58 : vector<1x1x128xf32> to vector<1x128xf32>
    %60 = arith.maximumf %57, %59 : vector<1x128xf32>
    %c0_64 = arith.constant 0 : index
    %c8 = arith.constant 8 : index
    %c0_65 = arith.constant 0 : index
    %61 = vector.load %arg15[%c0_64, %c8, %c0_65] : memref<1x16x128xf32, #tpu.memory_space<vmem>>, vector<1x1x128xf32>
    %62 = vector.shape_cast %61 : vector<1x1x128xf32> to vector<1x128xf32>
    %c0_66 = arith.constant 0 : index
    %c9 = arith.constant 9 : index
    %c0_67 = arith.constant 0 : index
    %63 = vector.load %arg15[%c0_66, %c9, %c0_67] : memref<1x16x128xf32, #tpu.memory_space<vmem>>, vector<1x1x128xf32>
    %64 = vector.shape_cast %63 : vector<1x1x128xf32> to vector<1x128xf32>
    %65 = arith.maximumf %62, %64 : vector<1x128xf32>
    %c0_68 = arith.constant 0 : index
    %c10 = arith.constant 10 : index
    %c0_69 = arith.constant 0 : index
    %66 = vector.load %arg15[%c0_68, %c10, %c0_69] : memref<1x16x128xf32, #tpu.memory_space<vmem>>, vector<1x1x128xf32>
    %67 = vector.shape_cast %66 : vector<1x1x128xf32> to vector<1x128xf32>
    %c0_70 = arith.constant 0 : index
    %c11 = arith.constant 11 : index
    %c0_71 = arith.constant 0 : index
    %68 = vector.load %arg15[%c0_70, %c11, %c0_71] : memref<1x16x128xf32, #tpu.memory_space<vmem>>, vector<1x1x128xf32>
    %69 = vector.shape_cast %68 : vector<1x1x128xf32> to vector<1x128xf32>
    %70 = arith.maximumf %67, %69 : vector<1x128xf32>
    %c0_72 = arith.constant 0 : index
    %c12 = arith.constant 12 : index
    %c0_73 = arith.constant 0 : index
    %71 = vector.load %arg15[%c0_72, %c12, %c0_73] : memref<1x16x128xf32, #tpu.memory_space<vmem>>, vector<1x1x128xf32>
    %72 = vector.shape_cast %71 : vector<1x1x128xf32> to vector<1x128xf32>
    %c0_74 = arith.constant 0 : index
    %c13 = arith.constant 13 : index
    %c0_75 = arith.constant 0 : index
    %73 = vector.load %arg15[%c0_74, %c13, %c0_75] : memref<1x16x128xf32, #tpu.memory_space<vmem>>, vector<1x1x128xf32>
    %74 = vector.shape_cast %73 : vector<1x1x128xf32> to vector<1x128xf32>
    %75 = arith.maximumf %72, %74 : vector<1x128xf32>
    %c0_76 = arith.constant 0 : index
    %c14 = arith.constant 14 : index
    %c0_77 = arith.constant 0 : index
    %76 = vector.load %arg15[%c0_76, %c14, %c0_77] : memref<1x16x128xf32, #tpu.memory_space<vmem>>, vector<1x1x128xf32>
    %77 = vector.shape_cast %76 : vector<1x1x128xf32> to vector<1x128xf32>
    %c0_78 = arith.constant 0 : index
    %c15 = arith.constant 15 : index
    %c0_79 = arith.constant 0 : index
    %78 = vector.load %arg15[%c0_78, %c15, %c0_79] : memref<1x16x128xf32, #tpu.memory_space<vmem>>, vector<1x1x128xf32>
    %79 = vector.shape_cast %78 : vector<1x1x128xf32> to vector<1x128xf32>
    %80 = arith.maximumf %77, %79 : vector<1x128xf32>
    %81 = tpu.concatenate %45, %50, %55, %60, %65, %70, %75, %80 in 1 : vector<1x128xf32>, vector<1x128xf32>, vector<1x128xf32>, vector<1x128xf32>, vector<1x128xf32>, vector<1x128xf32>, vector<1x128xf32>, vector<1x128xf32> -> vector<1x1024xf32>
    %c0_80 = arith.constant 0 : index
    %c0_81 = arith.constant 0 : index
    %82 = vector.load %arg6[%c0_80, %c0_81] : memref<1024x128xf32, #tpu.memory_space<vmem>>, vector<1024x128xf32>
    %cst_82 = arith.constant dense<0.000000e+00> : vector<1x128xf32>
    %83 = tpu.matmul %81, %82, %cst_82 {dimension_numbers = #tpu.dot_dimension_numbers<[1], [0], [0], [1], [0, 0, 1, 1], [], []>} : vector<1x1024xf32>, vector<1024x128xf32>, vector<1x128xf32> -> vector<1x128xf32>
    %c0_83 = arith.constant 0 : index
    %c0_84 = arith.constant 0 : index
    %84 = vector.load %arg7[%c0_83, %c0_84] : memref<1x128xf32, #tpu.memory_space<vmem>>, vector<1x128xf32>
    %85 = arith.addf %83, %84 : vector<1x128xf32>
    %cst_85 = arith.constant 0.000000e+00 : f32
    %86 = vector.broadcast %cst_85 : f32 to vector<1x128xf32>
    %87 = arith.maximumf %85, %86 : vector<1x128xf32>
    %c0_86 = arith.constant 0 : index
    %c0_87 = arith.constant 0 : index
    %88 = vector.load %arg8[%c0_86, %c0_87] : memref<128x128xf32, #tpu.memory_space<vmem>>, vector<128x128xf32>
    %cst_88 = arith.constant dense<0.000000e+00> : vector<1x128xf32>
    %89 = tpu.matmul %87, %88, %cst_88 {dimension_numbers = #tpu.dot_dimension_numbers<[1], [0], [0], [1], [0, 0, 1, 1], [], []>} : vector<1x128xf32>, vector<128x128xf32>, vector<1x128xf32> -> vector<1x128xf32>
    %c0_89 = arith.constant 0 : index
    %c0_90 = arith.constant 0 : index
    %90 = vector.load %arg9[%c0_89, %c0_90] : memref<1x128xf32, #tpu.memory_space<vmem>>, vector<1x128xf32>
    %91 = arith.addf %89, %90 : vector<1x128xf32>
    %cst_91 = arith.constant 0.000000e+00 : f32
    %92 = vector.broadcast %cst_91 : f32 to vector<1x128xf32>
    %93 = arith.maximumf %91, %92 : vector<1x128xf32>
    %c0_92 = arith.constant 0 : index
    %c0_93 = arith.constant 0 : index
    %94 = vector.load %arg10[%c0_92, %c0_93] : memref<128x128xf32, #tpu.memory_space<vmem>>, vector<128x128xf32>
    %cst_94 = arith.constant dense<0.000000e+00> : vector<1x128xf32>
    %95 = tpu.matmul %93, %94, %cst_94 {dimension_numbers = #tpu.dot_dimension_numbers<[1], [0], [0], [1], [0, 0, 1, 1], [], []>} : vector<1x128xf32>, vector<128x128xf32>, vector<1x128xf32> -> vector<1x128xf32>
    %c0_95 = arith.constant 0 : index
    %c0_96 = arith.constant 0 : index
    %96 = vector.load %arg11[%c0_95, %c0_96] : memref<1x128xf32, #tpu.memory_space<vmem>>, vector<1x128xf32>
    %97 = arith.addf %95, %96 : vector<1x128xf32>
    %c0_97 = arith.constant 0 : index
    %c0_98 = arith.constant 0 : index
    %c0_99 = arith.constant 0 : index
    %98 = vector.load %arg12[%c0_97, %c0_98, %c0_99] : memref<1x1x128xf32, #tpu.memory_space<vmem>>, vector<1x1x128xf32>
    %99 = vector.shape_cast %98 : vector<1x1x128xf32> to vector<1x128xf32>
    %100 = vector.shape_cast %97 : vector<1x128xf32> to vector<1x1x128xf32>
    tpu.vector_store %arg12[%c0_97, %c0_98, %c0_99], %100 {strides = array<i32>} : memref<1x1x128xf32, #tpu.memory_space<vmem>>, vector<1x1x128xf32>,
    return
  }
  func.func @transform_0(%arg0: i32) -> (i32, i32, i32) {
    %c0_i32 = arith.constant 0 : i32
    %c0_i32_0 = arith.constant 0 : i32
    %c0_i32_1 = arith.constant 0 : i32
    return %arg0, %c0_i32, %c0_i32_0 : i32, i32, i32
  }
  func.func @transform_1(%arg0: i32) -> (i32, i32) {
    %c0_i32 = arith.constant 0 : i32
    %c0_i32_0 = arith.constant 0 : i32
    %c0_i32_1 = arith.constant 0 : i32
    return %c0_i32, %c0_i32_0 : i32, i32
  }
  func.func @transform_2(%arg0: i32) -> (i32, i32) {
    %c0_i32 = arith.constant 0 : i32
    %c0_i32_0 = arith.constant 0 : i32
    %c0_i32_1 = arith.constant 0 : i32
    return %c0_i32, %c0_i32_0 : i32, i32
  }
  func.func @transform_3(%arg0: i32) -> (i32, i32) {
    %c0_i32 = arith.constant 0 : i32
    %c0_i32_0 = arith.constant 0 : i32
    %c0_i32_1 = arith.constant 0 : i32
    return %c0_i32, %c0_i32_0 : i32, i32
  }
  func.func @transform_4(%arg0: i32) -> (i32, i32) {
    %c0_i32 = arith.constant 0 : i32
    %c0_i32_0 = arith.constant 0 : i32
    %c0_i32_1 = arith.constant 0 : i32
    return %c0_i32, %c0_i32_0 : i32, i32
  }
  func.func @transform_5(%arg0: i32) -> (i32, i32) {
    %c0_i32 = arith.constant 0 : i32
    %c0_i32_0 = arith.constant 0 : i32
    %c0_i32_1 = arith.constant 0 : i32
    return %c0_i32, %c0_i32_0 : i32, i32
  }
  func.func @transform_6(%arg0: i32) -> (i32, i32) {
    %c0_i32 = arith.constant 0 : i32
    %c0_i32_0 = arith.constant 0 : i32
    %c0_i32_1 = arith.constant 0 : i32
    return %c0_i32, %c0_i32_0 : i32, i32
  }
  func.func @transform_7(%arg0: i32) -> (i32, i32) {
    %c0_i32 = arith.constant 0 : i32
    %c0_i32_0 = arith.constant 0 : i32
    %c0_i32_1 = arith.constant 0 : i32
    return %c0_i32, %c0_i32_0 : i32, i32
  }
  func.func @transform_8(%arg0: i32) -> (i32, i32) {
    %c0_i32 = arith.constant 0 : i32
    %c0_i32_0 = arith.constant 0 : i32
    %c0_i32_1 = arith.constant 0 : i32
    return %c0_i32, %c0_i32_0 : i32, i32
  }
  func.func @transform_9(%arg0: i32) -> (i32, i32) {
    %c0_i32 = arith.constant 0 : i32
    %c0_i32_0 = arith.constant 0 : i32
    %c0_i32_1 = arith.constant 0 : i32
    return %c0_i32, %c0_i32_0 : i32, i32
  }
  func.func @transform_10(%arg0: i32) -> (i32, i32) {
    %c0_i32 = arith.constant 0 : i32
    %c0_i32_0 = arith.constant 0 : i32
    %c0_i32_1 = arith.constant 0 : i32
    return %c0_i32, %c0_i32_0 : i32, i32
  }
  func.func @transform_11(%arg0: i32) -> (i32, i32, i32) {
    %c0_i32 = arith.constant 0 : i32
    %c0_i32_0 = arith.constant 0 : i32
    %c0_i32_1 = arith.constant 0 : i32
    return %arg0, %c0_i32, %c0_i32_0 : i32, i32, i32
  }
}

</mosaic_0001>

<bundles_post_ra>
// kernel: tile.13
= control target key start
LH: loop header
LB: loop body
LE: loop exit
PB: predicated region body
PF: predicated region fallthrough
CT: control target
= control target key end

     0   :  { %s28_s0 = inlined_call_operand.vmem [shape: f32[6], index: 0, kind: input, shape index: {}]   ;;  %s29_s1 = inlined_call_operand.vmem [shape: f32[16,6], index: 1, kind: output, shape index: {}]  }
   0x1   :  { %v4_v0 = vld [vmem:[%s28_s0] ss:$0 sm:$0xff] }
   0x2   :  { %5 = vst [vmem:[%s29_s1] sm:$0xff] %v4_v0  ;;  %8 = vst [vmem:[%s29_s1 + $0x8] sm:$0xff] %v4_v0 }

// kernel: tile.14
= control target key start
LH: loop header
LB: loop body
LE: loop exit
PB: predicated region body
PF: predicated region fallthrough
CT: control target
= control target key end

     0   :  { %s133_s10 = smov 90   ;;  %s134_s11 = smov 78   ;;  %vm3_vm0 = vcmask 48128   ;;  %vm9_vm1 = vcmask 786128   ;;  %vm15_vm2 = vcmask 736928   ;;  %vm21_vm3 = vcmask 687728   ;;  %s209_s0 = inlined_call_operand.vmem [shape: f32[16,6], index: 0, kind: input, shape index: {}]   ;;  %s210_s1 = inlined_call_operand.vmem [shape: f32[96], index: 1, kind: output, shape index: {}]  }
   0x1   :  { %v103_v0 = vld [vmem:[%s209_s0 + $0xf] sm:$0x1]   ;;  %v105_v1 = vld [vmem:[%s209_s0 + $0xd] sm:$0x1]   ;;  %v104_v2 = vld [vmem:[%s209_s0 + $0xe] sm:$0x1]  }
   0x2   :  { %7 = vrot.lane.b32.xlu0 %v103_v0, %s133_s10  ;;  %19 = vrot.lane.b32.xlu1 %v105_v1, %s134_s11  ;;  %v106_v3 = vld [vmem:[%s209_s0 + $0xc] sm:$0x1]   ;;  %s135_s16 = smov 84   ;;  %s136_s17 = smov 72   ;;  %v107_v4 = vld [vmem:[%s209_s0 + $0xb] sm:$0x1]  }
   0x3   :  { %v108_v5 = vld [vmem:[%s209_s0 + $0xa] sm:$0x1]   ;;  %v2_v6 = vld [vmem:[%s209_s0] sm:$0x1]   ;;  %s137_s24 = smov 66   ;;  %s138_s25 = smov 60  }
   0x4   :  { %4 = vst.msk [vmem:[#allocation0] sm:$0x1] %vm3_vm0, %v2_v6   ;;  %v109_v7 = vld [vmem:[%s209_s0 + $0x9] sm:$0x1]   ;;  %v110_v8 = vld [vmem:[%s209_s0 + $0x8] sm:$0x1]  }
   0x5   :  { %s139_s30 = smov 54   ;;  %s140_s2 = smov 48   ;;  %v111_v9 = vld [vmem:[%s209_s0 + $0x7] sm:$0x1]   ;;  %v112_v10 = vld [vmem:[%s209_s0 + $0x6] sm:$0x1]  }
   0x6   :  { %13 = vrot.lane.b32.xlu0 %v104_v2, %s135_s16  ;;  %25 = vrot.lane.b32.xlu1 %v106_v3, %s136_s17  ;;  %s141_s7 = smov 42   ;;  %s142_s8 = smov 36   ;;  %v113_v11 = vld [vmem:[%s209_s0 + $0x5] sm:$0x1]   ;;  %v114_v12 = vld [vmem:[%s209_s0 + $0x4] sm:$0x1]  }
   0x7   :  { %s143_s13 = smov 30   ;;  %s144_s14 = smov 24   ;;  %v115_v13 = vld [vmem:[%s209_s0 + $0x3] sm:$0x1]   ;;  %v116_v14 = vld [vmem:[%s209_s0 + $0x2] sm:$0x1]  }
   0x8   :  { %s145_s19 = smov 18   ;;  %s146_s20 = smov 12   ;;  %v117_v15 = vld [vmem:[%s209_s0 + $0x1] sm:$0x1]   ;;  %vm27_vm4 = vcmask 638528   ;;  %vm33_vm5 = vcmask 589328  }
   0x9   :  { %s147_s0 = smov 6   ;;  %vm39_vm6 = vcmask 540128   ;;  %vm45_vm7 = vcmask 490928   ;;  %vm51_vm8 = vcmask 441728   ;;  %vm57_vm9 = vcmask 392528  }
   0xa   :  { %31 = vrot.lane.b32.xlu0 %v107_v4, %s137_s24  ;;  %37 = vrot.lane.b32.xlu1 %v108_v5, %s138_s25  ;;  %vm63_vm10 = vcmask 343328   ;;  %vm69_vm11 = vcmask 294128   ;;  %vm75_vm12 = vcmask 244928   ;;  %vm81_vm13 = vcmask 195728  }
   0xb   :  { %vm87_vm14 = vcmask 146528   ;;  %vm93_vm15 = vcmask 97328  }
   0xe   :  { %43 = vrot.lane.b32.xlu0 %v109_v7, %s139_s30  ;;  %49 = vrot.lane.b32.xlu1 %v110_v8, %s140_s2 }
  0x12   :  { %55 = vrot.lane.b32.xlu0 %v111_v9, %s141_s7  ;;  %61 = vrot.lane.b32.xlu1 %v112_v10, %s142_s8 }
  0x16   :  { %67 = vrot.lane.b32.xlu0 %v113_v11, %s143_s13  ;;  %73 = vrot.lane.b32.xlu1 %v114_v12, %s144_s14 }
  0x1a   :  { %79 = vrot.lane.b32.xlu0 %v115_v13, %s145_s19  ;;  %85 = vrot.lane.b32.xlu1 %v116_v14, %s146_s20 }
  0x1e   :  { %91 = vrot.lane.b32.xlu0 %v117_v15, %s147_s0 }
  0x74   :  { %v8_v16 = vpop.permute.xlu0 %7   ;;  %v20_v17 = vpop.permute.xlu1 %19  }
  0x75   :  { %10 = vst.msk [vmem:[#allocation0] sm:$0x1] %vm9_vm1, %v8_v16  }
  0x78   :  { %v14_v18 = vpop.permute.xlu0 %13   ;;  %v26_v19 = vpop.permute.xlu1 %25  }
  0x79   :  { %16 = vst.msk [vmem:[#allocation0] sm:$0x1] %vm15_vm2, %v14_v18  }
  0x7a   :  { %22 = vst.msk [vmem:[#allocation0] sm:$0x1] %vm21_vm3, %v20_v17  }
  0x7b   :  { %28 = vst.msk [vmem:[#allocation0] sm:$0x1] %vm27_vm4, %v26_v19  }
  0x7c   :  { %v32_v20 = vpop.permute.xlu0 %31   ;;  %v38_v21 = vpop.permute.xlu1 %37  }
  0x7d   :  { %34 = vst.msk [vmem:[#allocation0] sm:$0x1] %vm33_vm5, %v32_v20  }
  0x7e   :  { %40 = vst.msk [vmem:[#allocation0] sm:$0x1] %vm39_vm6, %v38_v21  }
  0x80   :  { %v44_v22 = vpop.permute.xlu0 %43   ;;  %v50_v23 = vpop.permute.xlu1 %49  }
  0x81   :  { %46 = vst.msk [vmem:[#allocation0] sm:$0x1] %vm45_vm7, %v44_v22  }
  0x82   :  { %52 = vst.msk [vmem:[#allocation0] sm:$0x1] %vm51_vm8, %v50_v23  }
  0x84   :  { %v56_v24 = vpop.permute.xlu0 %55   ;;  %v62_v25 = vpop.permute.xlu1 %61  }
  0x85   :  { %58 = vst.msk [vmem:[#allocation0] sm:$0x1] %vm57_vm9, %v56_v24  }
  0x86   :  { %64 = vst.msk [vmem:[#allocation0] sm:$0x1] %vm63_vm10, %v62_v25  }
  0x88   :  { %v68_v26 = vpop.permute.xlu0 %67   ;;  %v74_v27 = vpop.permute.xlu1 %73  }
  0x89   :  { %70 = vst.msk [vmem:[#allocation0] sm:$0x1] %vm69_vm11, %v68_v26  }
  0x8a   :  { %76 = vst.msk [vmem:[#allocation0] sm:$0x1] %vm75_vm12, %v74_v27  }
  0x8c   :  { %v80_v28 = vpop.permute.xlu0 %79   ;;  %v86_v29 = vpop.permute.xlu1 %85  }
  0x8d   :  { %82 = vst.msk [vmem:[#allocation0] sm:$0x1] %vm81_vm13, %v80_v28  }
  0x8e   :  { %88 = vst.msk [vmem:[#allocation0] sm:$0x1] %vm87_vm14, %v86_v29  }
  0x90   :  { %v92_v30 = vpop.permute.xlu0 %91  }
  0x91   :  { %94 = vst.msk [vmem:[#allocation0] sm:$0x1] %vm93_vm15, %v92_v30  }
  0x98   :  { %v99_v31 = vld [vmem:[#allocation0] sm:$0x1] }
  0x99   :  { %102 = vst [vmem:[%s210_s1] sm:$0x1] %v99_v31 }

// kernel: tile.18
= control target key start
LH: loop header
LB: loop body
LE: loop exit
PB: predicated region body
PF: predicated region fallthrough
CT: control target
= control target key end

     0   :  { %s22_s0 = inlined_call_operand.vmem [shape: f32[16], index: 0, kind: input, shape index: {}]   ;;  %s23_s1 = inlined_call_operand.vmem [shape: f32[8,16], index: 1, kind: output, shape index: {}]  }
   0x1   :  { %v4_v0 = vld [vmem:[%s22_s0] ss:$0 sm:$0xff] }
   0x2   :  { %5 = vst [vmem:[%s23_s1] sm:$0xff] %v4_v0 }

// kernel: tile.19
= control target key start
LH: loop header
LB: loop body
LE: loop exit
PB: predicated region body
PF: predicated region fallthrough
CT: control target
= control target key end

     0   :  { %s69_s10 = smov 112   ;;  %s70_s11 = smov 80   ;;  %vm3_vm0 = vcmask 130048   ;;  %vm9_vm1 = vcmask 1048448   ;;  %vm15_vm2 = vcmask 917248   ;;  %vm21_vm3 = vcmask 786048   ;;  %s113_s0 = inlined_call_operand.vmem [shape: f32[8,16], index: 0, kind: input, shape index: {}]   ;;  %s114_s1 = inlined_call_operand.vmem [shape: f32[1,128], index: 1, kind: output, shape index: {}]  }
   0x1   :  { %v55_v0 = vld [vmem:[%s113_s0 + $0x7] sm:$0x1]   ;;  %v57_v1 = vld [vmem:[%s113_s0 + $0x5] sm:$0x1]   ;;  %v56_v2 = vld [vmem:[%s113_s0 + $0x6] sm:$0x1]  }
   0x2   :  { %7 = vrot.lane.b32.xlu0 %v55_v0, %s69_s10  ;;  %19 = vrot.lane.b32.xlu1 %v57_v1, %s70_s11  ;;  %v58_v3 = vld [vmem:[%s113_s0 + $0x4] sm:$0x1]   ;;  %v2_v4 = vld [vmem:[%s113_s0] sm:$0x1]   ;;  %s71_s18 = smov 96   ;;  %s72_s19 = smov 64  }
   0x3   :  { %4 = vst.msk [vmem:[#allocation0] sm:$0x1] %vm3_vm0, %v2_v4   ;;  %v59_v5 = vld [vmem:[%s113_s0 + $0x3] sm:$0x1]   ;;  %v60_v6 = vld [vmem:[%s113_s0 + $0x2] sm:$0x1]  }
   0x4   :  { %s73_s24 = smov 48   ;;  %s74_s25 = smov 32   ;;  %v61_v7 = vld [vmem:[%s113_s0 + $0x1] sm:$0x1]   ;;  %vm27_vm4 = vcmask 654848   ;;  %vm33_vm5 = vcmask 523648  }
   0x5   :  { %s75_s0 = smov 16   ;;  %vm39_vm6 = vcmask 392448   ;;  %vm45_vm7 = vcmask 261248  }
   0x6   :  { %13 = vrot.lane.b32.xlu0 %v56_v2, %s71_s18  ;;  %25 = vrot.lane.b32.xlu1 %v58_v3, %s72_s19 }
   0xa   :  { %31 = vrot.lane.b32.xlu0 %v59_v5, %s73_s24  ;;  %37 = vrot.lane.b32.xlu1 %v60_v6, %s74_s25 }
   0xe   :  { %43 = vrot.lane.b32.xlu0 %v61_v7, %s75_s0 }
  0x74   :  { %v8_v8 = vpop.permute.xlu0 %7   ;;  %v20_v9 = vpop.permute.xlu1 %19  }
  0x75   :  { %10 = vst.msk [vmem:[#allocation0] sm:$0x1] %vm9_vm1, %v8_v8  }
  0x78   :  { %v14_v10 = vpop.permute.xlu0 %13   ;;  %v26_v11 = vpop.permute.xlu1 %25  }
  0x79   :  { %16 = vst.msk [vmem:[#allocation0] sm:$0x1] %vm15_vm2, %v14_v10  }
  0x7a   :  { %22 = vst.msk [vmem:[#allocation0] sm:$0x1] %vm21_vm3, %v20_v9  }
  0x7b   :  { %28 = vst.msk [vmem:[#allocation0] sm:$0x1] %vm27_vm4, %v26_v11  }
  0x7c   :  { %v32_v12 = vpop.permute.xlu0 %31   ;;  %v38_v13 = vpop.permute.xlu1 %37  }
  0x7d   :  { %34 = vst.msk [vmem:[#allocation0] sm:$0x1] %vm33_vm5, %v32_v12  }
  0x7e   :  { %40 = vst.msk [vmem:[#allocation0] sm:$0x1] %vm39_vm6, %v38_v13  }
  0x80   :  { %v44_v14 = vpop.permute.xlu0 %43  }
  0x81   :  { %46 = vst.msk [vmem:[#allocation0] sm:$0x1] %vm45_vm7, %v44_v14  }
  0x88   :  { %v51_v15 = vld [vmem:[#allocation0] sm:$0x1] }
  0x89   :  { %54 = vst [vmem:[%s114_s1] sm:$0x1] %v51_v15 }

// kernel: simple_cnn_forward.1
= control target key start
LH: loop header
LB: loop body
LE: loop exit
PB: predicated region body
PF: predicated region fallthrough
CT: control target
= control target key end

     0   :  { %16 = vsyncpa [#allocation6], 0  ;;  %s3314_s0 = inlined_call_operand.vmem [shape: f32[2,34,128], index: 0, kind: input, shape index: {}]   ;;  %s3315_s1 = inlined_call_operand.vmem [shape: f32[384,256], index: 1, kind: input, shape index: {}]   ;;  %s3316_s2 = inlined_call_operand.vmem [shape: f32[1,128], index: 2, kind: input, shape index: {}]   ;;  %s3317_s3 = inlined_call_operand.vmem [shape: f32[384,256], index: 3, kind: input, shape index: {}]   ;;  %s3318_s4 = inlined_call_operand.vmem [shape: f32[1,128], index: 4, kind: input, shape index: {}]   ;;  %s3319_s5 = inlined_call_operand.vmem [shape: f32[1024,128], index: 5, kind: input, shape index: {}]   ;;  %s3320_s6 = inlined_call_operand.vmem [shape: f32[1,128], index: 6, kind: input, shape index: {}]   ;;  %s3321_s7 = inlined_call_operand.vmem [shape: f32[128,128], index: 7, kind: input, shape index: {}]   ;;  %s3322_s8 = inlined_call_operand.vmem [shape: f32[1,128], index: 8, kind: input, shape index: {}]   ;;  %s3323_s9 = inlined_call_operand.vmem [shape: f32[128,128], index: 9, kind: input, shape index: {}]   ;;  %s3324_s10 = inlined_call_operand.vmem [shape: f32[1,128], index: 10, kind: input, shape index: {}]   ;;  %s3325_s11 = inlined_call_operand.hbm [shape: f32[2,1,128], index: 11, kind: output, shape index: {}]  }
   0x1   :  { %18 = vsyncpa [#allocation6 + $0x1], 0  ;;  %s2088_s17 = smov 0   ;;  %s2090_s18 = smov 0  }
   0x2   :  { %s2092_s19 = smov 0   ;;  %s2094_s20 = smov 0  }
   0x3 LB: > { %s2109_s21 = sadd.s32 4294967295, %s2022_s20   ;;  %s1665_s22 = sadd.s32 4294967294, %s2022_s20   ;;  %s2022_s20 = sphi %s2094_s20, %s3333_s20   ;;  %s2018_s19 = sphi %s2092_s19, %s3332_s19   ;;  %s2014_s18 = sphi %s2090_s18, %s3331_s18   ;;  %s2010_s17 = sphi %s2088_s17, %s3330_s17  }
   0x4   : > { %s2113_s23 = sadd.s32 1, %s2022_s20   ;;  %s267_s24 = sadd.s32 1, %s2018_s19 }
   0x5   : > { %s264_s25 = ssub.s32 %s2022_s20, %s2113_s23  ;;  %p277_p0 = scmp.ne.s32.totalorder %s2018_s19, %s2014_s18 }
   0x6   : > { %p265_p1 = scmp.eq.s32.totalorder %s264_s25, 0  ;;  %p278_p2 = scmp.eq.s32.totalorder %s2109_s21, 1 }
   0x7   : > { %p283_p3 = scmp.ne.s32.totalorder %s2014_s18, %s2010_s17  ;;  %p284_p4 = scmp.eq.s32.totalorder %s1665_s22, 1 }
   0x8   : > { %s2124_s26 = scalar_select %p265_p1, %s2018_s19, %s267_s24  }
   0x9   : > { %p2126_p5 = por %p278_p2, %p277_p0  ;;  %p2130_p6 = por %p284_p4, %p283_p3 }
   0xa   : > { %3326 = sst [smem:[#allocation8_spill]] %s2124_s26  ;;  %p1668_p7 = scmp.ge.s32.totalorder %s2022_s20, 1 }
   0xb   : > { %p340_p8 = scmp.lt.s32.totalorder %s2022_s20, 3 }
   0xd   : > { %p341_p9 = pnand %p1668_p7, %p340_p8 }
   0xe   : > { %p379_p10 = scmp.lt.s32.totalorder (!%p341_p9), %s2109_s21, 1  ;;  %s2025_s13 = smov (!%p341_p9), 6  }
   0xf   : > { %344 = sbr.rel (%p341_p9) target bundleno = 1289 (0x509), region = 64  ;;  %s2027_s30 = smov (!%p341_p9), [#allocation5]  }
  0x14   : > { %v427_v0 = vld [vmem:[%s3315_s1 + $0xf8] sm:$0xff]  ;;  %v426_v1 = vld [vmem:[%s3315_s1 + $0xf0] sm:$0xff]  ;;  %v425_v2 = vld [vmem:[%s3315_s1 + $0xe8] sm:$0xff]  ;;  %v2024_v4 = vmov 0.0   ;;  %s2306_s24 = scalar_select %p379_p10, %s2109_s21, 1  ;;  %vm713_vm0 = vcmask 834608  }
  0x15   : > { %492 = vmatprep.subr.mxu0 %v427_v0  ;;  %v424_v3 = vld [vmem:[%s3315_s1 + $0xe0] sm:$0xff]  ;;  %645 = vmatprep.mubr.f32.mxu1 %v2024_v4  ;;  %702 = vst [vmem:[#allocation3] sm:$0xff] %v2024_v4  ;;  %703 = vst [vmem:[#allocation3 + $0x8] sm:$0xff] %v2024_v4  ;;  %v423_v5 = vld [vmem:[%s3315_s1 + $0xd8] sm:$0xff]  ;;  %vm2026_vm1 = vmmov 0  }
  0x16   : > { %704 = vst [vmem:[#allocation3 + $0x10] sm:$0x3] %v2024_v4  ;;  %493 = vmatpush1.msra.mxu0 %v426_v1  ;;  %v422_v6 = vld [vmem:[%s3315_s1 + $0xd0] sm:$0xff]  ;;  %v421_v7 = vld [vmem:[%s3315_s1 + $0xc8] sm:$0xff]  ;;  %v420_v8 = vld [vmem:[%s3315_s1 + $0xc0] sm:$0xff]  ;;  %s1919_s15 = smul.u32 40, %s2306_s24 }
  0x17   : > { %494 = vmatprep.subr.mxu0 %v425_v2  ;;  %v419_v9 = vld [vmem:[%s3315_s1 + $0xb8] sm:$0xff]  ;;  %v418_v10 = vld [vmem:[%s3315_s1 + $0xb0] sm:$0xff]  ;;  %v417_v11 = vld [vmem:[%s3315_s1 + $0xa8] sm:$0xff] }
  0x18   : > { %495 = vmatpush1.msra.mxu0 %v424_v3  ;;  %v416_v12 = vld [vmem:[%s3315_s1 + $0xa0] sm:$0xff]  ;;  %v415_v13 = vld [vmem:[%s3315_s1 + $0x98] sm:$0xff]  ;;  %v414_v15 = vld [vmem:[%s3315_s1 + $0x90] sm:$0xff]  ;;  %s2360_s24 = scalar_lea.vmem %s3314_s0, %s1919_s15  ;;  %s377_s15 = sand.u32 1, %s2014_s18  }
  0x19   : > { %496 = vmatprep.subr.mxu0 %v423_v5  ;;  %v491_v14 = vld [vmem:[%s3315_s1 + $0x2f8] sm:$0xff]  ;;  %v490_v16 = vld [vmem:[%s3315_s1 + $0x2f0] sm:$0xff]  ;;  %v489_v17 = vld [vmem:[%s3315_s1 + $0x2e8] sm:$0xff]  ;;  %s1598_s26 = scalar_lea.sflag [#allocation6], %s377_s15 }
  0x1a   : > { %497 = vmatpush1.msra.mxu0 %v422_v6  ;;  %581 = vmatprep.subr.mxu1 %v491_v14  ;;  %v413_v18 = vld [vmem:[%s3315_s1 + $0x88] sm:$0xff]  ;;  %v488_v19 = vld [vmem:[%s3315_s1 + $0x2e0] sm:$0xff]  ;;  %v487_v21 = vld [vmem:[%s3315_s1 + $0x2d8] sm:$0xff] }
  0x1b   : > { %498 = vmatprep.subr.mxu0 %v421_v7  ;;  %582 = vmatpush1.msra.mxu1 %v490_v16  ;;  %v412_v20 = vld [vmem:[%s3315_s1 + $0x80] sm:$0xff]  ;;  %v486_v22 = vld [vmem:[%s3315_s1 + $0x2d0] sm:$0xff]  ;;  %v411_v23 = vld [vmem:[%s3315_s1 + $0x78] sm:$0xff] }
  0x1c   : > { %499 = vmatpush1.msra.mxu0 %v420_v8  ;;  %583 = vmatprep.subr.mxu1 %v489_v17  ;;  %v485_v24 = vld [vmem:[%s3315_s1 + $0x2c8] sm:$0xff]  ;;  %v410_v25 = vld [vmem:[%s3315_s1 + $0x70] sm:$0xff]  ;;  %v484_v26 = vld [vmem:[%s3315_s1 + $0x2c0] sm:$0xff] }
  0x1d   : > { %500 = vmatprep.subr.mxu0 %v419_v9  ;;  %584 = vmatpush1.msra.mxu1 %v488_v19  ;;  %v409_v27 = vld [vmem:[%s3315_s1 + $0x68] sm:$0xff]  ;;  %v483_v28 = vld [vmem:[%s3315_s1 + $0x2b8] sm:$0xff]  ;;  %v408_v29 = vld [vmem:[%s3315_s1 + $0x60] sm:$0xff] }
  0x1e   : > { %501 = vmatpush1.msra.mxu0 %v418_v10  ;;  %585 = vmatprep.subr.mxu1 %v487_v21  ;;  %v482_v30 = vld [vmem:[%s3315_s1 + $0x2b0] sm:$0xff]  ;;  %v407_v31 = vld [vmem:[%s3315_s1 + $0x58] sm:$0xff]  ;;  %v481_v32 = vld [vmem:[%s3315_s1 + $0x2a8] sm:$0xff] }
  0x1f   : > { %502 = vmatprep.subr.mxu0 %v417_v11  ;;  %586 = vmatpush1.msra.mxu1 %v486_v22  ;;  %v406_v33 = vld [vmem:[%s3315_s1 + $0x50] sm:$0xff]  ;;  %v480_v34 = vld [vmem:[%s3315_s1 + $0x2a0] sm:$0xff]  ;;  %v405_v35 = vld [vmem:[%s3315_s1 + $0x48] sm:$0xff] }
  0x20   : > { %503 = vmatpush1.msra.mxu0 %v416_v12  ;;  %587 = vmatprep.subr.mxu1 %v485_v24  ;;  %v479_v36 = vld [vmem:[%s3315_s1 + $0x298] sm:$0xff]  ;;  %v404_v37 = vld [vmem:[%s3315_s1 + $0x40] sm:$0xff]  ;;  %v478_v38 = vld [vmem:[%s3315_s1 + $0x290] sm:$0xff] }
  0x21   : > { %504 = vmatprep.subr.mxu0 %v415_v13  ;;  %588 = vmatpush1.msra.mxu1 %v484_v26  ;;  %v403_v39 = vld [vmem:[%s3315_s1 + $0x38] sm:$0xff]  ;;  %v477_v40 = vld [vmem:[%s3315_s1 + $0x288] sm:$0xff]  ;;  %v402_v41 = vld [vmem:[%s3315_s1 + $0x30] sm:$0xff] }
  0x22   : > { %505 = vmatpush1.msra.mxu0 %v414_v15  ;;  %589 = vmatprep.subr.mxu1 %v483_v28  ;;  %v476_v42 = vld [vmem:[%s3315_s1 + $0x280] sm:$0xff]  ;;  %v401_v43 = vld [vmem:[%s3315_s1 + $0x28] sm:$0xff]  ;;  %v475_v44 = vld [vmem:[%s3315_s1 + $0x278] sm:$0xff] }
  0x23   : > { %506 = vmatprep.subr.mxu0 %v413_v18  ;;  %590 = vmatpush1.msra.mxu1 %v482_v30  ;;  %v400_v45 = vld [vmem:[%s3315_s1 + $0x20] sm:$0xff]  ;;  %v474_v46 = vld [vmem:[%s3315_s1 + $0x270] sm:$0xff]  ;;  %v399_v47 = vld [vmem:[%s3315_s1 + $0x18] sm:$0xff] }
  0x24   : > { %507 = vmatpush1.msra.mxu0 %v412_v20  ;;  %591 = vmatprep.subr.mxu1 %v481_v32  ;;  %v473_v48 = vld [vmem:[%s3315_s1 + $0x268] sm:$0xff]  ;;  %v398_v49 = vld [vmem:[%s3315_s1 + $0x10] sm:$0xff]  ;;  %v472_v50 = vld [vmem:[%s3315_s1 + $0x260] sm:$0xff] }
  0x25   : > { %508 = vmatprep.subr.mxu0 %v411_v23  ;;  %592 = vmatpush1.msra.mxu1 %v480_v34  ;;  %v397_v51 = vld [vmem:[%s3315_s1 + $0x8] sm:$0xff]  ;;  %v471_v52 = vld [vmem:[%s3315_s1 + $0x258] sm:$0xff]  ;;  %v396_v53 = vld [vmem:[%s3315_s1] sm:$0xff] }
  0x26   : > { %509 = vmatpush1.msra.mxu0 %v410_v25  ;;  %593 = vmatprep.subr.mxu1 %v479_v36  ;;  %v470_v54 = vld [vmem:[%s3315_s1 + $0x250] sm:$0xff]  ;;  %v459_v55 = vld [vmem:[%s3315_s1 + $0x1f8] sm:$0xff]  ;;  %v469_v56 = vld [vmem:[%s3315_s1 + $0x248] sm:$0xff] }
  0x27   : > { %510 = vmatprep.subr.mxu0 %v409_v27  ;;  %594 = vmatpush1.msra.mxu1 %v478_v38  ;;  %v458_v57 = vld [vmem:[%s3315_s1 + $0x1f0] sm:$0xff]  ;;  %v468_v58 = vld [vmem:[%s3315_s1 + $0x240] sm:$0xff]  ;;  %v457_v59 = vld [vmem:[%s3315_s1 + $0x1e8] sm:$0xff] }
  0x28   : > { %511 = vmatpush1.msra.mxu0 %v408_v29  ;;  %595 = vmatprep.subr.mxu1 %v477_v40  ;;  %v467_v60 = vld [vmem:[%s3315_s1 + $0x238] sm:$0xff]  ;;  %v456_v61 = vld [vmem:[%s3315_s1 + $0x1e0] sm:$0xff]  ;;  %v466_v62 = vld [vmem:[%s3315_s1 + $0x230] sm:$0xff] }
  0x29   : > { %512 = vmatprep.subr.mxu0 %v407_v31  ;;  %596 = vmatpush1.msra.mxu1 %v476_v42  ;;  %v455_v63 = vld [vmem:[%s3315_s1 + $0x1d8] sm:$0xff]  ;;  %v465_v0 = vld [vmem:[%s3315_s1 + $0x228] sm:$0xff]  ;;  %v454_v1 = vld [vmem:[%s3315_s1 + $0x1d0] sm:$0xff] }
  0x2a   : > { %513 = vmatpush1.msra.mxu0 %v406_v33  ;;  %597 = vmatprep.subr.mxu1 %v475_v44  ;;  %v464_v2 = vld [vmem:[%s3315_s1 + $0x220] sm:$0xff]  ;;  %v453_v3 = vld [vmem:[%s3315_s1 + $0x1c8] sm:$0xff]  ;;  %v463_v5 = vld [vmem:[%s3315_s1 + $0x218] sm:$0xff] }
  0x2b   : > { %514 = vmatprep.subr.mxu0 %v405_v35  ;;  %598 = vmatpush1.msra.mxu1 %v474_v46  ;;  %v452_v6 = vld [vmem:[%s3315_s1 + $0x1c0] sm:$0xff]  ;;  %v462_v7 = vld [vmem:[%s3315_s1 + $0x210] sm:$0xff]  ;;  %v451_v8 = vld [vmem:[%s3315_s1 + $0x1b8] sm:$0xff] }
  0x2c   : > { %515 = vmatpush1.msra.mxu0 %v404_v37  ;;  %599 = vmatprep.subr.mxu1 %v473_v48  ;;  %v461_v9 = vld [vmem:[%s3315_s1 + $0x208] sm:$0xff]  ;;  %v450_v10 = vld [vmem:[%s3315_s1 + $0x1b0] sm:$0xff]  ;;  %v460_v11 = vld [vmem:[%s3315_s1 + $0x200] sm:$0xff] }
  0x2d   : > { %516 = vmatprep.subr.mxu0 %v403_v39  ;;  %600 = vmatpush1.msra.mxu1 %v472_v50  ;;  %v449_v12 = vld [vmem:[%s3315_s1 + $0x1a8] sm:$0xff]  ;;  %v448_v14 = vld [vmem:[%s3315_s1 + $0x1a0] sm:$0xff]  ;;  %v447_v16 = vld [vmem:[%s3315_s1 + $0x198] sm:$0xff] }
  0x2e   : > { %517 = vmatpush1.msra.mxu0 %v402_v41  ;;  %601 = vmatprep.subr.mxu1 %v471_v52  ;;  %v392_v13 = vld [vmem:[%s2360_s24 + $0x2] sm:$0xff]  ;;  %v446_v17 = vld [vmem:[%s3315_s1 + $0x190] sm:$0xff]  ;;  %v443_v21 = vld [vmem:[%s3315_s1 + $0x178] sm:$0xff] }
  0x2f   : > { %518 = vmatprep.subr.mxu0 %v401_v43  ;;  %602 = vmatpush1.msra.mxu1 %v470_v54  ;;  %v388_v15 = vld [vmem:[%s2360_s24 + $0x1] sm:$0xff]  ;;  %v393_v19 = vld [vmem:[%s2360_s24 + $0xa] sm:$0xff]  ;;  %v394_v24 = vld [vmem:[%s2360_s24 + $0x12] sm:$0xff] }
  0x30   : > { %519 = vmatpush1.msra.mxu0 %v400_v45  ;;  %603 = vmatprep.subr.mxu1 %v469_v56  ;;  %v445_v18 = vld [vmem:[%s3315_s1 + $0x188] sm:$0xff]  ;;  %v444_v20 = vld [vmem:[%s3315_s1 + $0x180] sm:$0xff]  ;;  %v442_v22 = vld [vmem:[%s3315_s1 + $0x170] sm:$0xff] }
  0x31   : > { %520 = vmatprep.subr.mxu0 %v399_v47  ;;  %604 = vmatpush1.msra.mxu1 %v468_v58  ;;  %v441_v23 = vld [vmem:[%s3315_s1 + $0x168] sm:$0xff]  ;;  %v440_v25 = vld [vmem:[%s3315_s1 + $0x160] sm:$0xff]  ;;  %v439_v26 = vld [vmem:[%s3315_s1 + $0x158] sm:$0xff] }
  0x32   : > { %521 = vmatpush1.msra.mxu0 %v398_v49  ;;  %605 = vmatprep.subr.mxu1 %v467_v60  ;;  %v438_v27 = vld [vmem:[%s3315_s1 + $0x150] sm:$0xff]  ;;  %v437_v28 = vld [vmem:[%s3315_s1 + $0x148] sm:$0xff]  ;;  %v395_v29 = vld [vmem:[%s2360_s24 + $0x1a] sm:$0xff] }
  0x33   : > { %522 = vmatprep.subr.mxu0 %v397_v51  ;;  %606 = vmatpush1.msra.mxu1 %v466_v62  ;;  %v436_v30 = vld [vmem:[%s3315_s1 + $0x140] sm:$0xff]  ;;  %v435_v31 = vld [vmem:[%s3315_s1 + $0x138] sm:$0xff]  ;;  %v434_v32 = vld [vmem:[%s3315_s1 + $0x130] sm:$0xff] }
  0x34   : > { %523 = vmatpush1.msra.mxu0 %v396_v53  ;;  %607 = vmatprep.subr.mxu1 %v465_v0  ;;  %v433_v33 = vld [vmem:[%s3315_s1 + $0x128] sm:$0xff]  ;;  %v432_v34 = vld [vmem:[%s3315_s1 + $0x120] sm:$0xff]  ;;  %v431_v35 = vld [vmem:[%s3315_s1 + $0x118] sm:$0xff] }
  0x35   : > { %524 = vmatprep.subr.mxu0 %v459_v55  ;;  %608 = vmatpush1.msra.mxu1 %v464_v2  ;;  %v430_v36 = vld [vmem:[%s3315_s1 + $0x110] sm:$0xff]  ;;  %v429_v37 = vld [vmem:[%s3315_s1 + $0x108] sm:$0xff]  ;;  %v428_v38 = vld [vmem:[%s3315_s1 + $0x100] sm:$0xff] }
  0x36   : > { %525 = vmatpush2.msra.mxu0 %v458_v57  ;;  %609 = vmatprep.subr.mxu1 %v463_v5  ;;  %v384_v39 = vld [vmem:[%s2360_s24] sm:$0xff]  ;;  %v389_v40 = vld [vmem:[%s2360_s24 + $0x9] sm:$0xff]  ;;  %v390_v42 = vld [vmem:[%s2360_s24 + $0x11] sm:$0xff] }
  0x37   : > { %526 = vmatprep.subr.mxu0 %v457_v59  ;;  %610 = vmatpush1.msra.mxu1 %v462_v7  ;;  %v385_v41 = vld [vmem:[%s2360_s24 + $0x8] sm:$0xff]  ;;  %v386_v43 = vld [vmem:[%s2360_s24 + $0x10] sm:$0xff]  ;;  %v391_v44 = vld [vmem:[%s2360_s24 + $0x19] sm:$0xff] }
  0x38   : > { %527 = vmatpush2.msra.mxu0 %v456_v61  ;;  %611 = vmatprep.subr.mxu1 %v461_v9  ;;  %v387_v45 = vld [vmem:[%s2360_s24 + $0x18] sm:$0xff]  ;;  %v752_v47 = vld [vmem:[%s3317_s3 + $0xf0] sm:$0xff]  ;;  %v751_v48 = vld [vmem:[%s3317_s3 + $0xe8] sm:$0xff]  ;;  %s378_s24 = scalar_lea.vmem [#allocation5], %s377_s15 }
  0x39   : > { %528 = vmatprep.subr.mxu0 %v455_v63  ;;  %612 = vmatpush1.msra.mxu1 %v460_v11  ;;  %v753_v46 = vld [vmem:[%s3317_s3 + $0xf8] sm:$0xff]  ;;  %v750_v49 = vld [vmem:[%s3317_s3 + $0xe0] sm:$0xff]  ;;  %v748_v51 = vld [vmem:[%s3317_s3 + $0xd0] sm:$0xff]  ;;  %s1610_s14 = sshll.u32 %s378_s24, 4  ;;  %s1611_s14 = int_to_ptr.vmem [resolvable:$true] %s1610_s14 }
  0x3a   : > { %529 = vmatpush2.msra.mxu0 %v454_v1  ;;  %646 = vmatmul.mubr.f32.vlgmr.msra.gmra.mxu1 %v392_v13  ;;  %v749_v50 = vld [vmem:[%s3317_s3 + $0xd8] sm:$0xff]  ;;  %v747_v52 = vld [vmem:[%s3317_s3 + $0xc8] sm:$0xff]  ;;  %v746_v53 = vld [vmem:[%s3317_s3 + $0xc0] sm:$0xff]  ;;  %s1962_s29 = scalar_lea.vmem %s1611_s14, 16 }
  0x3b   : > { %530 = vmatprep.subr.mxu0 %v453_v3  ;;  %556 = vmatprep.mubr.f32.mxu0 %v388_v15  ;;  %v745_v54 = vld [vmem:[%s3317_s3 + $0xb8] sm:$0xff]  ;;  %v744_v55 = vld [vmem:[%s3317_s3 + $0xb0] sm:$0xff]  ;;  %v743_v56 = vld [vmem:[%s3317_s3 + $0xa8] sm:$0xff]  ;;  %p1963_p11 = scmp.ne.s32.totalorder %s1611_s14, %s1962_s29 }
  0x3c   : > { %531 = vmatpush2.msra.mxu0 %v452_v6  ;;  %651 = vmatprep.mubr.f32.mxu1 %v2024_v4  ;;  %v742_v57 = vld [vmem:[%s3317_s3 + $0xa0] sm:$0xff]  ;;  %v741_v58 = vld [vmem:[%s3317_s3 + $0x98] sm:$0xff]  ;;  %v740_v59 = vld [vmem:[%s3317_s3 + $0x90] sm:$0xff] }
  0x3d   : > { %532 = vmatprep.subr.mxu0 %v451_v8  ;;  %818 = vmatprep.subr.mxu1 %v753_v46  ;;  %v739_v60 = vld [vmem:[%s3317_s3 + $0x88] sm:$0xff]  ;;  %v738_v61 = vld [vmem:[%s3317_s3 + $0x80] sm:$0xff]  ;;  %v817_v62 = vld [vmem:[%s3317_s3 + $0x2f8] sm:$0xff]  ;;  %p1964_p12 = pnand %p1963_p11, %p2126_p5 }
  0x3e   : > { %533 = vmatpush2.msra.mxu0 %v450_v10  ;;  %652 = vmatmul.mubr.f32.gmra.mxu1 %v393_v19  ;;  %v737_v63 = vld [vmem:[%s3317_s3 + $0x78] sm:$0xff]  ;;  %v816_v0 = vld [vmem:[%s3317_s3 + $0x2f0] sm:$0xff]  ;;  %v815_v1 = vld [vmem:[%s3317_s3 + $0x2e8] sm:$0xff] }
  0x3f   : > { %534 = vmatprep.subr.mxu0 %v449_v12  ;;  %657 = vmatprep.mubr.f32.mxu1 %v2024_v4  ;;  %v736_v2 = vld [vmem:[%s3317_s3 + $0x70] sm:$0xff]  ;;  %v814_v3 = vld [vmem:[%s3317_s3 + $0x2e0] sm:$0xff]  ;;  %v735_v5 = vld [vmem:[%s3317_s3 + $0x68] sm:$0xff]  ;;  %p1965_p13 = pneg %p1964_p12 }
  0x40   : > { %535 = vmatpush2.msra.mxu0 %v448_v14  ;;  %819 = vmatpush1.msra.mxu1 %v752_v47  ;;  %v813_v6 = vld [vmem:[%s3317_s3 + $0x2d8] sm:$0xff]  ;;  %v812_v7 = vld [vmem:[%s3317_s3 + $0x2d0] sm:$0xff]  ;;  %v734_v8 = vld [vmem:[%s3317_s3 + $0x60] sm:$0xff] }
  0x41   : > { %536 = vmatprep.subr.mxu0 %v447_v16  ;;  %820 = vmatprep.subr.mxu1 %v751_v48  ;;  %v811_v9 = vld [vmem:[%s3317_s3 + $0x2c8] sm:$0xff]  ;;  %v733_v10 = vld [vmem:[%s3317_s3 + $0x58] sm:$0xff]  ;;  %v810_v11 = vld [vmem:[%s3317_s3 + $0x2c0] sm:$0xff] }
  0x42   : > { %537 = vmatpush2.msra.mxu0 %v446_v17  ;;  %658 = vmatmul.mubr.f32.gmra.mxu1 %v394_v24  ;;  %v732_v12 = vld [vmem:[%s3317_s3 + $0x50] sm:$0xff]  ;;  %v809_v13 = vld [vmem:[%s3317_s3 + $0x2b8] sm:$0xff]  ;;  %v731_v14 = vld [vmem:[%s3317_s3 + $0x48] sm:$0xff] }
  0x43   : > { %538 = vmatprep.subr.mxu0 %v445_v18  ;;  %663 = vmatprep.mubr.f32.mxu1 %v2024_v4  ;;  %v808_v15 = vld [vmem:[%s3317_s3 + $0x2b0] sm:$0xff]  ;;  %v730_v16 = vld [vmem:[%s3317_s3 + $0x40] sm:$0xff]  ;;  %v807_v17 = vld [vmem:[%s3317_s3 + $0x2a8] sm:$0xff] }
  0x44   : > { %539 = vmatpush2.msra.mxu0 %v444_v20  ;;  %821 = vmatpush1.msra.mxu1 %v750_v49  ;;  %v729_v18 = vld [vmem:[%s3317_s3 + $0x38] sm:$0xff]  ;;  %v806_v19 = vld [vmem:[%s3317_s3 + $0x2a0] sm:$0xff]  ;;  %v728_v20 = vld [vmem:[%s3317_s3 + $0x30] sm:$0xff] }
  0x45   : > { %540 = vmatprep.subr.mxu0 %v443_v21  ;;  %822 = vmatprep.subr.mxu1 %v749_v50  ;;  %v805_v21 = vld [vmem:[%s3317_s3 + $0x298] sm:$0xff]  ;;  %v726_v24 = vld [vmem:[%s3317_s3 + $0x20] sm:$0xff]  ;;  %v768_v48 = vld [vmem:[%s3317_s3 + $0x170] sm:$0xff] }
  0x46   : > { %541 = vmatpush2.msra.mxu0 %v442_v22  ;;  %664 = vmatmul.mubr.f32.gmra.mxu1 %v395_v29  ;;  %v727_v22 = vld [vmem:[%s3317_s3 + $0x28] sm:$0xff]  ;;  %v770_v46 = vld [vmem:[%s3317_s3 + $0x180] sm:$0xff]  ;;  %v769_v47 = vld [vmem:[%s3317_s3 + $0x178] sm:$0xff] }
  0x47   : > { %542 = vmatprep.subr.mxu0 %v441_v23  ;;  %823 = vmatpush1.msra.mxu1 %v748_v51  ;;  %v804_v23 = vld [vmem:[%s3317_s3 + $0x290] sm:$0xff]  ;;  %v723_v29 = vld [vmem:[%s3317_s3 + $0x8] sm:$0xff]  ;;  %v766_v50 = vld [vmem:[%s3317_s3 + $0x160] sm:$0xff] }
  0x48   : > { %543 = vmatpush2.msra.mxu0 %v440_v25  ;;  %824 = vmatprep.subr.mxu1 %v747_v52  ;;  %v803_v25 = vld [vmem:[%s3317_s3 + $0x288] sm:$0xff]  ;;  %v765_v51 = vld [vmem:[%s3317_s3 + $0x158] sm:$0xff]  ;;  %v764_v52 = vld [vmem:[%s3317_s3 + $0x150] sm:$0xff] }
  0x49   : > { %544 = vmatprep.subr.mxu0 %v439_v26  ;;  %825 = vmatpush1.msra.mxu1 %v746_v53  ;;  %v725_v26 = vld [vmem:[%s3317_s3 + $0x18] sm:$0xff]  ;;  %v767_v49 = vld [vmem:[%s3317_s3 + $0x168] sm:$0xff] }
  0x4a   : > { %545 = vmatpush2.msra.mxu0 %v438_v27  ;;  %826 = vmatprep.subr.mxu1 %v745_v54  ;;  %v802_v27 = vld [vmem:[%s3317_s3 + $0x280] sm:$0xff]  ;;  %v763_v53 = vld [vmem:[%s3317_s3 + $0x148] sm:$0xff] }
  0x4b   : > { %546 = vmatprep.subr.mxu0 %v437_v28  ;;  %827 = vmatpush1.msra.mxu1 %v744_v55  ;;  %v724_v28 = vld [vmem:[%s3317_s3 + $0x10] sm:$0xff] }
  0x4c   : > { %547 = vmatpush2.msra.mxu0 %v436_v30  ;;  %828 = vmatprep.subr.mxu1 %v743_v56  ;;  %v722_v30 = vld [vmem:[%s3317_s3] sm:$0xff] }
  0x4d   : > { %548 = vmatprep.subr.mxu0 %v435_v31  ;;  %829 = vmatpush1.msra.mxu1 %v742_v57  ;;  %v785_v31 = vld [vmem:[%s3317_s3 + $0x1f8] sm:$0xff] }
  0x4e   : > { %549 = vmatpush2.msra.mxu0 %v434_v32  ;;  %830 = vmatprep.subr.mxu1 %v741_v58  ;;  %v784_v32 = vld [vmem:[%s3317_s3 + $0x1f0] sm:$0xff] }
  0x4f   : > { %550 = vmatprep.subr.mxu0 %v433_v33  ;;  %831 = vmatpush1.msra.mxu1 %v740_v59  ;;  %v783_v33 = vld [vmem:[%s3317_s3 + $0x1e8] sm:$0xff] }
  0x50   : > { %551 = vmatpush2.msra.mxu0 %v432_v34  ;;  %832 = vmatprep.subr.mxu1 %v739_v60  ;;  %v782_v34 = vld [vmem:[%s3317_s3 + $0x1e0] sm:$0xff] }
  0x51   : > { %552 = vmatprep.subr.mxu0 %v431_v35  ;;  %833 = vmatpush1.msra.mxu1 %v738_v61  ;;  %v781_v35 = vld [vmem:[%s3317_s3 + $0x1d8] sm:$0xff] }
  0x52   : > { %553 = vmatpush2.msra.mxu0 %v430_v36  ;;  %834 = vmatprep.subr.mxu1 %v737_v63  ;;  %v780_v36 = vld [vmem:[%s3317_s3 + $0x1d0] sm:$0xff]  ;;  %v1670_v63 = vld [vmem:[%s3316_s2] ss:$0 sm:$0xff] }
  0x53   : > { %554 = vmatprep.subr.mxu0 %v429_v37  ;;  %835 = vmatpush1.msra.mxu1 %v736_v2  ;;  %v779_v37 = vld [vmem:[%s3317_s3 + $0x1c8] sm:$0xff] }
  0x54   : > { %555 = vmatpush2.msra.mxu0 %v428_v38  ;;  %836 = vmatprep.subr.mxu1 %v735_v5  ;;  %v778_v38 = vld [vmem:[%s3317_s3 + $0x1c0] sm:$0xff] }
  0x55   : > { %557 = vmatmul.mubr.f32.vlgmr.msra.gmra.mxu0 %v384_v39  ;;  %895 = vmatprep.subr.mxu0 %v817_v62  ;;  %v777_v39 = vld [vmem:[%s3317_s3 + $0x1b8] sm:$0xff] }
  0x56   : > { %562 = vmatprep.mubr.f32.mxu0 %v389_v40  ;;  %896 = vmatpush1.msra.mxu0 %v816_v0  ;;  %v776_v40 = vld [vmem:[%s3317_s3 + $0x1b0] sm:$0xff] }
  0x57   : > { %897 = vmatprep.subr.mxu0 %v815_v1  ;;  %837 = vmatpush1.msra.mxu1 %v734_v8 }
  0x58   : > { %898 = vmatpush1.msra.mxu0 %v814_v3  ;;  %838 = vmatprep.subr.mxu1 %v733_v10 }
  0x59   : > { %563 = vmatmul.mubr.f32.gmra.mxu0 %v385_v41  ;;  %899 = vmatprep.subr.mxu0 %v813_v6  ;;  %v775_v41 = vld [vmem:[%s3317_s3 + $0x1a8] sm:$0xff] }
  0x5a   : > { %568 = vmatprep.mubr.f32.mxu0 %v390_v42  ;;  %900 = vmatpush1.msra.mxu0 %v812_v7  ;;  %v774_v42 = vld [vmem:[%s3317_s3 + $0x1a0] sm:$0xff] }
  0x5b   : > { %901 = vmatprep.subr.mxu0 %v811_v9  ;;  %839 = vmatpush1.msra.mxu1 %v732_v12 }
  0x5c   : > { %902 = vmatpush1.msra.mxu0 %v810_v11  ;;  %840 = vmatprep.subr.mxu1 %v731_v14 }
  0x5d   : > { %569 = vmatmul.mubr.f32.gmra.mxu0 %v386_v43  ;;  %903 = vmatprep.subr.mxu0 %v809_v13  ;;  %v773_v43 = vld [vmem:[%s3317_s3 + $0x198] sm:$0xff] }
  0x5e   : > { %574 = vmatprep.mubr.f32.mxu0 %v391_v44  ;;  %904 = vmatpush1.msra.mxu0 %v808_v15  ;;  %v772_v44 = vld [vmem:[%s3317_s3 + $0x190] sm:$0xff] }
  0x5f   : > { %841 = vmatpush1.msra.mxu1 %v730_v16  ;;  %905 = vmatprep.subr.mxu0 %v807_v17  ;;  %v762_v16 = vld [vmem:[%s3317_s3 + $0x140] sm:$0xff]  ;;  %v801_v17 = vld [vmem:[%s3317_s3 + $0x278] sm:$0xff] }
  0x60   : > { %842 = vmatprep.subr.mxu1 %v729_v18  ;;  %906 = vmatpush1.msra.mxu0 %v806_v19  ;;  %v761_v19 = vld [vmem:[%s3317_s3 + $0x138] sm:$0xff] }
  0x61   : > { %575 = vmatmul.mubr.f32.gmra.mxu0 %v387_v45  ;;  %843 = vmatpush1.msra.mxu1 %v728_v20  ;;  %v771_v45 = vld [vmem:[%s3317_s3 + $0x188] sm:$0xff]  ;;  %v800_v20 = vld [vmem:[%s3317_s3 + $0x270] sm:$0xff] }
  0x62   : > { %959 = vmatprep.mubr.f32.mxu0 %v2024_v4  ;;  %907 = vmatprep.subr.mxu0 %v805_v21  ;;  %v760_v21 = vld [vmem:[%s3317_s3 + $0x130] sm:$0xff] }
  0x63   : > { %844 = vmatprep.subr.mxu1 %v727_v22  ;;  %908 = vmatpush1.msra.mxu0 %v804_v23 }
  0x64   : > { %845 = vmatpush1.msra.mxu1 %v726_v24  ;;  %909 = vmatprep.subr.mxu0 %v803_v25  ;;  %v799_v24 = vld [vmem:[%s3317_s3 + $0x268] sm:$0xff] }
  0x65   : > { %846 = vmatprep.subr.mxu1 %v725_v26  ;;  %910 = vmatpush1.msra.mxu0 %v802_v27  ;;  %v759_v25 = vld [vmem:[%s3317_s3 + $0x128] sm:$0xff]  ;;  %v798_v26 = vld [vmem:[%s3317_s3 + $0x260] sm:$0xff] }
  0x66   : > { %847 = vmatpush1.msra.mxu1 %v724_v28  ;;  %911 = vmatprep.subr.mxu0 %v801_v17  ;;  %v1071_v17 = vld [vmem:[%s3319_s5 + $0x1e0] sm:$0xff] }
  0x67   : > { %848 = vmatprep.subr.mxu1 %v723_v29  ;;  %912 = vmatpush1.msra.mxu0 %v800_v20  ;;  %v758_v29 = vld [vmem:[%s3317_s3 + $0x120] sm:$0xff]  ;;  %v1038_v20 = vld [vmem:[%s3319_s5 + $0xd8] sm:$0xff] }
  0x68   : > { %849 = vmatpush1.msra.mxu1 %v722_v30  ;;  %913 = vmatprep.subr.mxu0 %v799_v24  ;;  %v797_v30 = vld [vmem:[%s3317_s3 + $0x258] sm:$0xff]  ;;  %v1037_v24 = vld [vmem:[%s3319_s5 + $0xd0] sm:$0xff] }
  0x69   : > { %850 = vmatprep.subr.mxu1 %v785_v31  ;;  %v757_v31 = vld [vmem:[%s3317_s3 + $0x118] sm:$0xff]  ;;  %914 = vmatpush1.msra.mxu0 %v798_v26  ;;  %v1021_v26 = vld [vmem:[%s3319_s5 + $0x50] sm:$0xff] }
  0x6a   : > { %851 = vmatpush2.msra.mxu1 %v784_v32  ;;  %915 = vmatprep.subr.mxu0 %v797_v30  ;;  %v1020_v30 = vld [vmem:[%s3319_s5 + $0x48] sm:$0xff] }
  0x6b   : > { %852 = vmatprep.subr.mxu1 %v783_v33 }
  0x6c   : > { %853 = vmatpush2.msra.mxu1 %v782_v34 }
  0x6d   : > { %854 = vmatprep.subr.mxu1 %v781_v35  ;;  %v796_v35 = vld [vmem:[%s3317_s3 + $0x250] sm:$0xff] }
  0x6e   : > { %855 = vmatpush2.msra.mxu1 %v780_v36  ;;  %v756_v36 = vld [vmem:[%s3317_s3 + $0x110] sm:$0xff]  ;;  %916 = vmatpush1.msra.mxu0 %v796_v35  ;;  %v1051_v35 = vld [vmem:[%s3319_s5 + $0x140] sm:$0xff] }
  0x6f   : > { %856 = vmatprep.subr.mxu1 %v779_v37  ;;  %v795_v37 = vld [vmem:[%s3317_s3 + $0x248] sm:$0xff] }
  0x70   : > { %857 = vmatpush2.msra.mxu1 %v778_v38  ;;  %v755_v38 = vld [vmem:[%s3317_s3 + $0x108] sm:$0xff]  ;;  %917 = vmatprep.subr.mxu0 %v795_v37  ;;  %v1066_v37 = vld [vmem:[%s3319_s5 + $0x1b8] sm:$0xff] }
  0x71   : > { %858 = vmatprep.subr.mxu1 %v777_v39  ;;  %v794_v39 = vld [vmem:[%s3317_s3 + $0x240] sm:$0xff] }
  0x72   : > { %859 = vmatpush2.msra.mxu1 %v776_v40  ;;  %918 = vmatpush1.msra.mxu0 %v794_v39  ;;  %v1050_v39 = vld [vmem:[%s3319_s5 + $0x138] sm:$0xff] }
  0x73   : > { %860 = vmatprep.subr.mxu1 %v775_v41 }
  0x74   : > { %861 = vmatpush2.msra.mxu1 %v774_v42 }
  0x75   : > { %862 = vmatprep.subr.mxu1 %v773_v43  ;;  %v754_v43 = vld [vmem:[%s3317_s3 + $0x100] sm:$0xff] }
  0x76   : > { %863 = vmatpush2.msra.mxu1 %v772_v44  ;;  %v793_v44 = vld [vmem:[%s3317_s3 + $0x238] sm:$0xff] }
  0x77   : > { %864 = vmatprep.subr.mxu1 %v771_v45  ;;  %919 = vmatprep.subr.mxu0 %v793_v44  ;;  %v792_v45 = vld [vmem:[%s3317_s3 + $0x230] sm:$0xff]  ;;  %v1032_v44 = vld [vmem:[%s3319_s5 + $0xa8] sm:$0xff] }
  0x78   : > { %865 = vmatpush2.msra.mxu1 %v770_v46  ;;  %920 = vmatpush1.msra.mxu0 %v792_v45  ;;  %v1064_v45 = vld [vmem:[%s3319_s5 + $0x1a8] sm:$0xff] }
  0x79   : > { %866 = vmatprep.subr.mxu1 %v769_v47  ;;  %v791_v47 = vld [vmem:[%s3317_s3 + $0x228] sm:$0xff] }
  0x7a   : > { %867 = vmatpush2.msra.mxu1 %v768_v48  ;;  %v790_v48 = vld [vmem:[%s3317_s3 + $0x220] sm:$0xff]  ;;  %921 = vmatprep.subr.mxu0 %v791_v47  ;;  %v1048_v47 = vld [vmem:[%s3319_s5 + $0x128] sm:$0xff] }
  0x7b   : > { %868 = vmatprep.subr.mxu1 %v767_v49  ;;  %v789_v49 = vld [vmem:[%s3317_s3 + $0x218] sm:$0xff]  ;;  %922 = vmatpush1.msra.mxu0 %v790_v48  ;;  %v1031_v48 = vld [vmem:[%s3319_s5 + $0xa0] sm:$0xff] }
  0x7c   : > { %869 = vmatpush2.msra.mxu1 %v766_v50  ;;  %923 = vmatprep.subr.mxu0 %v789_v49  ;;  %v1063_v49 = vld [vmem:[%s3319_s5 + $0x1a0] sm:$0xff] }
  0x7d   : > { %870 = vmatprep.subr.mxu1 %v765_v51 }
  0x7e   : > { %871 = vmatpush2.msra.mxu1 %v764_v52  ;;  %v788_v52 = vld [vmem:[%s3317_s3 + $0x210] sm:$0xff] }
  0x7f   : > { %872 = vmatprep.subr.mxu1 %v763_v53  ;;  %924 = vmatpush1.msra.mxu0 %v788_v52  ;;  %v1030_v52 = vld [vmem:[%s3319_s5 + $0x98] sm:$0xff] }
  0x80   : > { %873 = vmatpush2.msra.mxu1 %v762_v16  ;;  %v1039_v16 = vld [vmem:[%s3319_s5 + $0xe0] sm:$0xff] }
  0x81   : > { %874 = vmatprep.subr.mxu1 %v761_v19  ;;  %v1055_v19 = vld [vmem:[%s3319_s5 + $0x160] sm:$0xff] }
  0x82   : > { %875 = vmatpush2.msra.mxu1 %v760_v21  ;;  %v1070_v21 = vld [vmem:[%s3319_s5 + $0x1d8] sm:$0xff] }
  0x83   : > { %876 = vmatprep.subr.mxu1 %v759_v25  ;;  %v1069_v25 = vld [vmem:[%s3319_s5 + $0x1d0] sm:$0xff] }
  0x84   : > { %877 = vmatpush2.msra.mxu1 %v758_v29  ;;  %v1068_v29 = vld [vmem:[%s3319_s5 + $0x1c8] sm:$0xff] }
  0x85   : > { %878 = vmatprep.subr.mxu1 %v757_v31  ;;  %v1052_v31 = vld [vmem:[%s3319_s5 + $0x148] sm:$0xff] }
  0x86   : > { %879 = vmatpush2.msra.mxu1 %v756_v36  ;;  %v1034_v36 = vld [vmem:[%s3319_s5 + $0xb8] sm:$0xff] }
  0x87   : > { %880 = vmatprep.subr.mxu1 %v755_v38  ;;  %v1018_v38 = vld [vmem:[%s3319_s5 + $0x38] sm:$0xff] }
  0x88   : > { %881 = vmatpush2.msra.mxu1 %v754_v43  ;;  %v1049_v43 = vld [vmem:[%s3319_s5 + $0x130] sm:$0xff] }
  0xfa   : > { %v647_v54 = vpop.f32.mrf.mxu1 }
  0xfc   : > { %v649_v55 = vpop.f32.mrf.mxu1 }
  0xfe   : > { %v653_v56 = vpop.f32.mrf.mxu1 }
 0x100   : > { %v655_v57 = vpop.f32.mrf.mxu1 }
 0x102   : > { %v659_v60 = vpop.f32.mrf.mxu1 }
 0x104   : > { %v661_v3 = vpop.f32.mrf.mxu1 }
 0x106   : > { %v665_v12 = vpop.f32.mrf.mxu1 }
 0x108   : > { %v667_v27 = vpop.f32.mrf.mxu1 }
 0x115   : > { %v558_v58 = vpop.f32.mrf.mxu0 }
 0x116   : > { %v648_v61 = vadd.f32 %v647_v54, %v558_v58  ;;  %v787_v54 = vld [vmem:[%s3317_s3 + $0x208] sm:$0xff] }
 0x117   : > { %v560_v59 = vpop.f32.mrf.mxu0  ;;  %925 = vmatprep.subr.mxu0 %v787_v54  ;;  %v1014_v54 = vld [vmem:[%s3319_s5 + $0x18] sm:$0xff] }
 0x118   : > { %v650_v62 = vadd.f32 %v649_v55, %v560_v59  ;;  %v786_v55 = vld [vmem:[%s3317_s3 + $0x200] sm:$0xff]  ;;  %v1042_v59 = vld [vmem:[%s3319_s5 + $0xf8] sm:$0xff] }
 0x119   : > { %v564_v0 = vpop.f32.mrf.mxu0  ;;  %926 = vmatpush1.msra.mxu0 %v786_v55  ;;  %v1046_v55 = vld [vmem:[%s3319_s5 + $0x118] sm:$0xff] }
 0x11a   : > { %v670_v1 = vmax.f32 %v648_v61, %v650_v62  ;;  %v654_v6 = vadd.f32 %v653_v56, %v564_v0  ;;  %1675 = vmatprep.subr.mxu0 %v1042_v59  ;;  %v1045_v59 = vld [vmem:[%s3319_s5 + $0x110] sm:$0xff] }
 0x11b   : > { %v566_v2 = vpop.f32.mrf.mxu0 }
 0x11c   : > { %v681_v5 = vadd.f32 %v1670_v63, %v670_v1  ;;  %v656_v7 = vadd.f32 %v655_v57, %v566_v2  ;;  %v1058_v1 = vld [vmem:[%s3319_s5 + $0x178] sm:$0xff]  ;;  %v1073_v2 = vld [vmem:[%s3319_s5 + $0x1f0] sm:$0xff] }
 0x11d   : > { %v570_v8 = vpop.f32.mrf.mxu0 }
 0x11e   : > { %v685_v9 = vmax.f32 %v681_v5, 0.0  ;;  %v671_v10 = vmax.f32 %v654_v6, %v656_v7  ;;  %v660_v14 = vadd.f32 %v659_v60, %v570_v8  ;;  %v1074_v60 = vld [vmem:[%s3319_s5 + $0x1f8] sm:$0xff] }
 0x11f   : > { %v572_v11 = vpop.f32.mrf.mxu0  ;;  %1710 = vmatprep.subr.mxu1 %v1074_v60  ;;  %v1026_v5 = vld [vmem:[%s3319_s5 + $0x78] sm:$0xff]  ;;  %v1028_v60 = vld [vmem:[%s3319_s5 + $0x88] sm:$0xff] }
 0x120   : > { %689 = vst [vmem:[#allocation2] sm:$0xff] %v685_v9  ;;  %v682_v13 = vadd.f32 %v1670_v63, %v671_v10  ;;  %v662_v15 = vadd.f32 %v661_v3, %v572_v11  ;;  %v1057_v3 = vld [vmem:[%s3319_s5 + $0x170] sm:$0xff] }
 0x121   : > { %v576_v18 = vpop.f32.mrf.mxu0  ;;  %v1041_v9 = vld [vmem:[%s3319_s5 + $0xf0] sm:$0xff] }
 0x122   : > { %v686_v22 = vmax.f32 %v682_v13, 0.0  ;;  %v672_v23 = vmax.f32 %v660_v14, %v662_v15  ;;  %v666_v33 = vadd.f32 %v665_v12, %v576_v18  ;;  %v1025_v10 = vld [vmem:[%s3319_s5 + $0x70] sm:$0xff]  ;;  %v1040_v12 = vld [vmem:[%s3319_s5 + $0xe8] sm:$0xff]  ;;  %v1023_v18 = vld [vmem:[%s3319_s5 + $0x60] sm:$0xff] }
 0x123   : > { %v578_v28 = vpop.f32.mrf.mxu0  ;;  %v1072_v13 = vld [vmem:[%s3319_s5 + $0x1e8] sm:$0xff] }
 0x124   : > { %690 = vst [vmem:[#allocation2 + $0x8] sm:$0xff] %v686_v22  ;;  %v683_v32 = vadd.f32 %v1670_v63, %v672_v23  ;;  %v668_v34 = vadd.f32 %v667_v27, %v578_v28  ;;  %v1024_v14 = vld [vmem:[%s3319_s5 + $0x68] sm:$0xff]  ;;  %v1022_v22 = vld [vmem:[%s3319_s5 + $0x58] sm:$0xff]  ;;  %v1053_v27 = vld [vmem:[%s3319_s5 + $0x150] sm:$0xff] }
 0x125   : > { %v1056_v15 = vld [vmem:[%s3319_s5 + $0x168] sm:$0xff]  ;;  %v1054_v23 = vld [vmem:[%s3319_s5 + $0x158] sm:$0xff] }
 0x126   : > { %v687_v40 = vmax.f32 %v683_v32, 0.0  ;;  %v673_v41 = vmax.f32 %v666_v33, %v668_v34  ;;  %v1036_v28 = vld [vmem:[%s3319_s5 + $0xc8] sm:$0xff]  ;;  %v1035_v32 = vld [vmem:[%s3319_s5 + $0xc0] sm:$0xff] }
 0x127   : > { %v1067_v33 = vld [vmem:[%s3319_s5 + $0x1c0] sm:$0xff] }
 0x128   : > { %691 = vst [vmem:[#allocation2 + $0x10] sm:$0xff] %v687_v40  ;;  %v684_v42 = vadd.f32 %v1670_v63, %v673_v41  ;;  %v1019_v34 = vld [vmem:[%s3319_s5 + $0x40] sm:$0xff]  ;;  %v1033_v40 = vld [vmem:[%s3319_s5 + $0xb0] sm:$0xff] }
 0x129   : > { %v1065_v41 = vld [vmem:[%s3319_s5 + $0x1b0] sm:$0xff] }
 0x12a   : > { %v688_v46 = vmax.f32 %v684_v42, 0.0  ;;  %v1017_v42 = vld [vmem:[%s3319_s5 + $0x30] sm:$0xff] }
 0x12b   : > { %v693_v50 = vld [vmem:[#allocation2] ss:$2 sm:$0xff]  ;;  %v697_v51 = vld [vmem:[#allocation2 + $0x1] ss:$2 sm:$0xff] }
 0x12c   : > { %692 = vst [vmem:[#allocation2 + $0x18] sm:$0xff] %v688_v46  ;;  %v700_v53 = vmax.f32 %v693_v50, %v697_v51  ;;  %v1016_v46 = vld [vmem:[%s3319_s5 + $0x28] sm:$0xff]  ;;  %v1015_v50 = vld [vmem:[%s3319_s5 + $0x20] sm:$0xff] }
 0x12d   : > { %v1047_v51 = vld [vmem:[%s3319_s5 + $0x120] sm:$0xff] }
 0x12e   : > { %707 = vrot.lane.b32.xlu0 %v700_v53, %s2025_s13  ;;  %v1062_v53 = vld [vmem:[%s3319_s5 + $0x198] sm:$0xff] }
 0x133   : > { %v695_v56 = vld [vmem:[#allocation2 + $0x10] ss:$2 sm:$0xff]  ;;  %v699_v57 = vld [vmem:[#allocation2 + $0x11] ss:$2 sm:$0xff] }
 0x134   : > { %v701_v58 = vmax.f32 %v695_v56, %v699_v57  ;;  %v1029_v56 = vld [vmem:[%s3319_s5 + $0x90] sm:$0xff] }
 0x135   : > { %v1061_v57 = vld [vmem:[%s3319_s5 + $0x190] sm:$0xff] }
 0x136   : > { %709 = vrot.lane.b32.xlu0 %v701_v58, %s2025_s13  ;;  %v1013_v58 = vld [vmem:[%s3319_s5 + $0x10] sm:$0xff]  ;;  %s1672_s13 = sshll.u32 %s2109_s21, 4  ;;  %s1966_s21 = sshll.u32 %s2027_s30, 4  ;;  %s1967_s21 = int_to_ptr.vmem [resolvable:$false] %s1966_s21 }
 0x137   : > { %s3279_s25 = scalar_lea.hbm %s3325_s11, %s1672_s13  ;;  %s1968_s12 = scalar_lea.vmem %s1967_s21, 32 }
 0x138   : > { %p1969_p0 = scmp.lt.s32.totalorder %s1611_s14, %s1967_s21  ;;  %p1970_p1 = scmp.lt.s32.totalorder %s1968_s12, %s1962_s29 }
 0x13a   : > { %p1971_p2 = por %p1970_p1, %p1969_p0 }
 0x13c   : > { %p1972_p3 = pnand %p1971_p2, %p1965_p13 }
 0x1a0   : > { %v708_v61 = vpop.permute.xlu0 %707 }
 0x1a1   : > { %714 = vst.msk [vmem:[#allocation3 + $0x1] sm:$0xff] %vm713_vm0, %v708_v61  ;;  %v1060_v61 = vld [vmem:[%s3319_s5 + $0x188] sm:$0xff] }
 0x1a8   : > { %v710_v62 = vpop.permute.xlu0 %709  ;;  %v718_v63 = vld [vmem:[#allocation3 + $0x1] sm:$0xff] }
 0x1a9   : > { %v716_v0 = vld [vmem:[#allocation3] sm:$0xff]  ;;  %715 = vst.msk [vmem:[#allocation3 + $0x9] sm:$0xff] %vm713_vm0, %v710_v62  ;;  %882 = vmatprep.mubr.f32.mxu1 %v718_v63  ;;  %v1012_v62 = vld [vmem:[%s3319_s5 + $0x8] sm:$0xff] }
 0x1aa   : > { %883 = vmatmul.mubr.f32.vlgmr.msra.gmra.mxu1 %v716_v0  ;;  %v1044_v63 = vld [vmem:[%s3319_s5 + $0x108] sm:$0xff]  ;;  %v1027_v0 = vld [vmem:[%s3319_s5 + $0x80] sm:$0xff] }
 0x1ab   : > { %1711 = vmatpush3.msra.mxu1 %v1058_v1  ;;  %v1059_v1 = vld [vmem:[%s3319_s5 + $0x180] sm:$0xff] }
 0x1ac   : > { %1712 = vmatprep.subr.mxu1 %v1073_v2  ;;  %v1011_v2 = vld [vmem:[%s3319_s5] sm:$0xff] }
 0x1ad   : > { %1713 = vmatpush3.msra.mxu1 %v1057_v3  ;;  %v1043_v3 = vld [vmem:[%s3319_s5 + $0x100] sm:$0xff] }
 0x1ae   : > { %1714 = vmatprep.subr.mxu1 %v1072_v13 }
 0x1af   : > { %1715 = vmatpush3.msra.mxu1 %v1056_v15 }
 0x1b0   : > { %v719_v6 = vld [vmem:[#allocation3 + $0x9] sm:$0xff]  ;;  %1716 = vmatprep.subr.mxu1 %v1071_v17 }
 0x1b1   : > { %v720_v7 = vld [vmem:[#allocation3 + $0x2] sm:$0xff]  ;;  %888 = vmatprep.mubr.f32.mxu1 %v719_v6  ;;  %v721_v11 = vld [vmem:[#allocation3 + $0xa] sm:$0xff]  ;;  %1717 = vmatpush3.msra.mxu1 %v1055_v19  ;;  %v1138_v6 = vld [vmem:[%s3319_s5 + $0x3f8] sm:$0xff] }
 0x1b2   : > { %v717_v8 = vld [vmem:[#allocation3 + $0x8] sm:$0xff]  ;;  %960 = vmatmul.mubr.f32.vlgmr.msra.gmra.mxu0 %v720_v7  ;;  %1718 = vmatprep.subr.mxu1 %v1070_v21 }
 0x1b3   : > { %889 = vmatmul.mubr.f32.gmra.mxu1 %v717_v8  ;;  %965 = vmatprep.mubr.f32.mxu0 %v2024_v4 }
 0x1b4   : > { %1676 = vmatpush3.msra.mxu0 %v1026_v5  ;;  %1719 = vmatpush3.msra.mxu1 %v1054_v23  ;;  %v1106_v5 = vld [vmem:[%s3319_s5 + $0x2f8] sm:$0xff] }
 0x1b5   : > { %1677 = vmatprep.subr.mxu0 %v1041_v9  ;;  %1720 = vmatprep.subr.mxu1 %v1069_v25 }
 0x1b6   : > { %966 = vmatmul.mubr.f32.gmra.mxu0 %v721_v11  ;;  %1721 = vmatpush3.msra.mxu1 %v1053_v27 }
 0x1b7   : > { %1678 = vmatpush3.msra.mxu0 %v1025_v10  ;;  %1722 = vmatprep.subr.mxu1 %v1068_v29  ;;  %v1090_v29 = vld [vmem:[%s3319_s5 + $0x278] sm:$0xff] }
 0x1b8   : > { %1679 = vmatprep.subr.mxu0 %v1040_v12  ;;  %1723 = vmatpush3.msra.mxu1 %v1052_v31 }
 0x1b9   : > { %1680 = vmatpush3.msra.mxu0 %v1024_v14  ;;  %1724 = vmatprep.subr.mxu1 %v1067_v33  ;;  %v1671_v14 = vld [vmem:[%s3318_s4] ss:$0 sm:$0xff] }
 0x1ba   : > { %1681 = vmatprep.subr.mxu0 %v1039_v16  ;;  %1725 = vmatpush3.msra.mxu1 %v1051_v35 }
 0x1bb   : > { %1682 = vmatpush3.msra.mxu0 %v1023_v18  ;;  %1726 = vmatprep.subr.mxu1 %v1066_v37 }
 0x1bc   : > { %1683 = vmatprep.subr.mxu0 %v1038_v20  ;;  %1727 = vmatpush3.msra.mxu1 %v1050_v39 }
 0x1bd   : > { %1684 = vmatpush3.msra.mxu0 %v1022_v22  ;;  %1728 = vmatprep.subr.mxu1 %v1065_v41  ;;  %v1137_v41 = vld [vmem:[%s3319_s5 + $0x3f0] sm:$0xff] }
 0x1be   : > { %1685 = vmatprep.subr.mxu0 %v1037_v24  ;;  %1729 = vmatpush3.msra.mxu1 %v1049_v43 }
 0x1bf   : > { %1686 = vmatpush3.msra.mxu0 %v1021_v26  ;;  %1730 = vmatprep.subr.mxu1 %v1064_v45 }
 0x1c0   : > { %1687 = vmatprep.subr.mxu0 %v1036_v28  ;;  %1731 = vmatpush3.msra.mxu1 %v1048_v47  ;;  %v1104_v47 = vld [vmem:[%s3319_s5 + $0x2e8] sm:$0xff] }
 0x1c1   : > { %1688 = vmatpush3.msra.mxu0 %v1020_v30  ;;  %1732 = vmatprep.subr.mxu1 %v1063_v49 }
 0x1c2   : > { %1689 = vmatprep.subr.mxu0 %v1035_v32  ;;  %1733 = vmatpush3.msra.mxu1 %v1047_v51 }
 0x1c3   : > { %1690 = vmatpush3.msra.mxu0 %v1019_v34  ;;  %1734 = vmatprep.subr.mxu1 %v1062_v53  ;;  %v1120_v53 = vld [vmem:[%s3319_s5 + $0x368] sm:$0xff] }
 0x1c4   : > { %1691 = vmatprep.subr.mxu0 %v1034_v36  ;;  %1735 = vmatpush3.msra.mxu1 %v1046_v55  ;;  %v1135_v55 = vld [vmem:[%s3319_s5 + $0x3e0] sm:$0xff] }
 0x1c5   : > { %1692 = vmatpush3.msra.mxu0 %v1018_v38  ;;  %1736 = vmatprep.subr.mxu1 %v1061_v57  ;;  %v1122_v38 = vld [vmem:[%s3319_s5 + $0x378] sm:$0xff]  ;;  %v1119_v57 = vld [vmem:[%s3319_s5 + $0x360] sm:$0xff] }
 0x1c6   : > { %1693 = vmatprep.subr.mxu0 %v1033_v40  ;;  %1737 = vmatpush3.msra.mxu1 %v1045_v59  ;;  %v1105_v40 = vld [vmem:[%s3319_s5 + $0x2f0] sm:$0xff]  ;;  %v1134_v59 = vld [vmem:[%s3319_s5 + $0x3d8] sm:$0xff] }
 0x1c7   : > { %1694 = vmatpush3.msra.mxu0 %v1017_v42  ;;  %1738 = vmatprep.subr.mxu1 %v1060_v61  ;;  %v1089_v42 = vld [vmem:[%s3319_s5 + $0x270] sm:$0xff]  ;;  %v1118_v61 = vld [vmem:[%s3319_s5 + $0x358] sm:$0xff] }
 0x1c8   : > { %1695 = vmatprep.subr.mxu0 %v1032_v44  ;;  %1739 = vmatpush3.msra.mxu1 %v1044_v63  ;;  %v1133_v63 = vld [vmem:[%s3319_s5 + $0x3d0] sm:$0xff] }
 0x1c9   : > { %1696 = vmatpush3.msra.mxu0 %v1016_v46  ;;  %1740 = vmatprep.subr.mxu1 %v1059_v1  ;;  %v1121_v46 = vld [vmem:[%s3319_s5 + $0x370] sm:$0xff] }
 0x1ca   : > { %1697 = vmatprep.subr.mxu0 %v1031_v48  ;;  %1741 = vmatpush3.msra.mxu1 %v1043_v3  ;;  %v1117_v1 = vld [vmem:[%s3319_s5 + $0x350] sm:$0xff]  ;;  %v1132_v3 = vld [vmem:[%s3319_s5 + $0x3c8] sm:$0xff] }
 0x1cb   : > { %1698 = vmatpush3.msra.mxu0 %v1015_v50  ;;  %1780 = vmatprep.subr.mxu1 %v1138_v6  ;;  %v1136_v50 = vld [vmem:[%s3319_s5 + $0x3e8] sm:$0xff] }
 0x1cc   : > { %1699 = vmatprep.subr.mxu0 %v1030_v52  ;;  %v1088_v52 = vld [vmem:[%s3319_s5 + $0x268] sm:$0xff] }
 0x1cd   : > { %1700 = vmatpush3.msra.mxu0 %v1014_v54  ;;  %v1103_v54 = vld [vmem:[%s3319_s5 + $0x2e0] sm:$0xff]  ;;  %v1116_v6 = vld [vmem:[%s3319_s5 + $0x348] sm:$0xff] }
 0x1ce   : > { %1701 = vmatprep.subr.mxu0 %v1029_v56  ;;  %v1087_v56 = vld [vmem:[%s3319_s5 + $0x260] sm:$0xff] }
 0x1cf   : > { %1702 = vmatpush3.msra.mxu0 %v1013_v58  ;;  %v1102_v58 = vld [vmem:[%s3319_s5 + $0x2d8] sm:$0xff] }
 0x1d0   : > { %1703 = vmatprep.subr.mxu0 %v1028_v60  ;;  %v1086_v60 = vld [vmem:[%s3319_s5 + $0x258] sm:$0xff] }
 0x1d1   : > { %1704 = vmatpush3.msra.mxu0 %v1012_v62  ;;  %v1101_v62 = vld [vmem:[%s3319_s5 + $0x2d0] sm:$0xff] }
 0x1d2   : > { %1705 = vmatprep.subr.mxu0 %v1027_v0  ;;  %v1085_v0 = vld [vmem:[%s3319_s5 + $0x250] sm:$0xff] }
 0x1d3   : > { %1706 = vmatpush3.msra.mxu0 %v1011_v2  ;;  %v1100_v2 = vld [vmem:[%s3319_s5 + $0x2c8] sm:$0xff] }
 0x1d4   : > { %1745 = vmatprep.subr.mxu0 %v1106_v5  ;;  %v1084_v5 = vld [vmem:[%s3319_s5 + $0x248] sm:$0xff] }
 0x26a   : > { %v884_v7 = vpop.f32.mrf.mxu1 }
 0x26c   : > { %v886_v8 = vpop.f32.mrf.mxu1 }
 0x272   : > { %v961_v9 = vpop.f32.mrf.mxu0 }
 0x273   : > { %v890_v10 = vpop.f32.mrf.mxu1  ;;  %v962_v12 = vadd.f32 %v961_v9, %v884_v7  ;;  %v1099_v7 = vld [vmem:[%s3319_s5 + $0x2c0] sm:$0xff] }
 0x274   : > { %v963_v11 = vpop.f32.mrf.mxu0  ;;  %v1083_v9 = vld [vmem:[%s3319_s5 + $0x240] sm:$0xff] }
 0x275   : > { %v964_v13 = vadd.f32 %v963_v11, %v886_v8  ;;  %v892_v17 = vpop.f32.mrf.mxu1  ;;  %v1131_v8 = vld [vmem:[%s3319_s5 + $0x3c0] sm:$0xff]  ;;  %v1098_v11 = vld [vmem:[%s3319_s5 + $0x2b8] sm:$0xff] }
 0x276   : > { %v967_v15 = vpop.f32.mrf.mxu0 }
 0x277   : > { %v972_v16 = vmax.f32 %v962_v12, %v964_v13  ;;  %v968_v20 = vadd.f32 %v967_v15, %v890_v10  ;;  %v1115_v10 = vld [vmem:[%s3319_s5 + $0x340] sm:$0xff]  ;;  %v1130_v12 = vld [vmem:[%s3319_s5 + $0x3b8] sm:$0xff]  ;;  %v1097_v15 = vld [vmem:[%s3319_s5 + $0x2b0] sm:$0xff] }
 0x278   : > { %v969_v18 = vpop.f32.mrf.mxu0  ;;  %v1082_v13 = vld [vmem:[%s3319_s5 + $0x238] sm:$0xff] }
 0x279   : > { %v981_v19 = vadd.f32 %v1671_v14, %v972_v16  ;;  %v970_v21 = vadd.f32 %v969_v18, %v892_v17  ;;  %v1129_v16 = vld [vmem:[%s3319_s5 + $0x3b0] sm:$0xff] }
 0x27a   : > { %v1081_v17 = vld [vmem:[%s3319_s5 + $0x230] sm:$0xff] }
 0x27b   : > { %v983_v22 = vmax.f32 %v981_v19, 0.0  ;;  %v973_v23 = vmax.f32 %v968_v20, %v970_v21  ;;  %v1113_v18 = vld [vmem:[%s3319_s5 + $0x330] sm:$0xff]  ;;  %v1096_v19 = vld [vmem:[%s3319_s5 + $0x2a8] sm:$0xff] }
 0x27c   : > { %v1128_v20 = vld [vmem:[%s3319_s5 + $0x3a8] sm:$0xff] }
 0x27d   : > { %985 = vst [vmem:[#allocation4] sm:$0xff] %v983_v22  ;;  %v982_v24 = vadd.f32 %v1671_v14, %v973_v23  ;;  %v1114_v14 = vld [vmem:[%s3319_s5 + $0x338] sm:$0xff]  ;;  %v1080_v21 = vld [vmem:[%s3319_s5 + $0x228] sm:$0xff]  ;;  %v1095_v23 = vld [vmem:[%s3319_s5 + $0x2a0] sm:$0xff] }
 0x27e   : > { %v1112_v22 = vld [vmem:[%s3319_s5 + $0x328] sm:$0xff] }
 0x27f   : > { %v984_v25 = vmax.f32 %v982_v24, 0.0  ;;  %v1127_v24 = vld [vmem:[%s3319_s5 + $0x3a0] sm:$0xff] }
 0x281   : > { %986 = vst [vmem:[#allocation4 + $0x8] sm:$0xff] %v984_v25  ;;  %v1079_v25 = vld [vmem:[%s3319_s5 + $0x220] sm:$0xff] }
 0x284   : > { %v990_v26 = vld [vmem:[#allocation4 + $0x2] sm:$0x1]  ;;  %v991_v27 = vld [vmem:[#allocation4 + $0x3] sm:$0x1]  ;;  %v996_v28 = vld [vmem:[#allocation4 + $0x6] sm:$0x1] }
 0x285   : > { %v992_v30 = vmax.f32 %v990_v26, %v991_v27  ;;  %v997_v31 = vld [vmem:[#allocation4 + $0x7] sm:$0x1]  ;;  %v987_v32 = vld [vmem:[#allocation4] sm:$0x1]  ;;  %v988_v33 = vld [vmem:[#allocation4 + $0x1] sm:$0x1] }
 0x286   : > { %v998_v34 = vmax.f32 %v996_v28, %v997_v31  ;;  %v989_v35 = vmax.f32 %v987_v32, %v988_v33  ;;  %v993_v36 = vld [vmem:[#allocation4 + $0x4] sm:$0x1]  ;;  %v994_v37 = vld [vmem:[#allocation4 + $0x5] sm:$0x1]  ;;  %v1111_v26 = vld [vmem:[%s3319_s5 + $0x320] sm:$0xff] }
 0x287   : > { %1204 = vmatprep.mubr.f32.mxu0 %v992_v30  ;;  %v995_v39 = vmax.f32 %v993_v36, %v994_v37  ;;  %v1094_v27 = vld [vmem:[%s3319_s5 + $0x298] sm:$0xff]  ;;  %v1093_v31 = vld [vmem:[%s3319_s5 + $0x290] sm:$0xff]  ;;  %v1124_v36 = vld [vmem:[%s3319_s5 + $0x388] sm:$0xff] }
 0x288   : > { %1274 = vmatprep.mubr.f32.mxu1 %v998_v34  ;;  %1205 = vmatmul.mubr.f32.vlgmr.msra.gmra.mxu0 %v989_v35  ;;  %v1002_v43 = vld [vmem:[#allocation4 + $0xa] sm:$0x1]  ;;  %v1003_v44 = vld [vmem:[#allocation4 + $0xb] sm:$0x1]  ;;  %v1008_v45 = vld [vmem:[#allocation4 + $0xe] sm:$0x1] }
 0x289   : > { %1275 = vmatmul.mubr.f32.vlgmr.msra.gmra.mxu1 %v995_v39  ;;  %1746 = vmatpush3.msra.mxu0 %v1090_v29  ;;  %v1004_v48 = vmax.f32 %v1002_v43, %v1003_v44  ;;  %v1009_v49 = vld [vmem:[#allocation4 + $0xf] sm:$0x1]  ;;  %v1126_v28 = vld [vmem:[%s3319_s5 + $0x398] sm:$0xff]  ;;  %v1125_v32 = vld [vmem:[%s3319_s5 + $0x390] sm:$0xff] }
 0x28a   : > { %1781 = vmatpush3.msra.mxu1 %v1122_v38  ;;  %1747 = vmatprep.subr.mxu0 %v1105_v40  ;;  %v1010_v51 = vmax.f32 %v1008_v45, %v1009_v49  ;;  %v1078_v29 = vld [vmem:[%s3319_s5 + $0x218] sm:$0xff]  ;;  %v1077_v33 = vld [vmem:[%s3319_s5 + $0x210] sm:$0xff]  ;;  %v1092_v35 = vld [vmem:[%s3319_s5 + $0x288] sm:$0xff] }
 0x28b   : > { %1782 = vmatprep.subr.mxu1 %v1137_v41  ;;  %1748 = vmatpush3.msra.mxu0 %v1089_v42  ;;  %v1110_v30 = vld [vmem:[%s3319_s5 + $0x318] sm:$0xff]  ;;  %v1109_v34 = vld [vmem:[%s3319_s5 + $0x310] sm:$0xff]  ;;  %v1076_v37 = vld [vmem:[%s3319_s5 + $0x208] sm:$0xff] }
 0x28c   : > { %1783 = vmatpush3.msra.mxu1 %v1121_v46  ;;  %1749 = vmatprep.subr.mxu0 %v1104_v47  ;;  %v1108_v38 = vld [vmem:[%s3319_s5 + $0x308] sm:$0xff]  ;;  %v1091_v39 = vld [vmem:[%s3319_s5 + $0x280] sm:$0xff]  ;;  %v1436_v49 = vld [vmem:[%s3321_s7 + $0x78] sm:$0xff] }
 0x28d   : > { %1344 = vmatprep.mubr.f32.mxu0 %v1004_v48  ;;  %1784 = vmatprep.subr.mxu1 %v1136_v50  ;;  %v1123_v40 = vld [vmem:[%s3319_s5 + $0x380] sm:$0xff]  ;;  %v1435_v50 = vld [vmem:[%s3321_s7 + $0x70] sm:$0xff] }
 0x28e   : > { %1414 = vmatprep.mubr.f32.mxu1 %v1010_v51  ;;  %1750 = vmatpush3.msra.mxu0 %v1088_v52  ;;  %v999_v41 = vld [vmem:[#allocation4 + $0x8] sm:$0x1]  ;;  %v1000_v42 = vld [vmem:[#allocation4 + $0x9] sm:$0x1]  ;;  %v1005_v44 = vld [vmem:[#allocation4 + $0xc] sm:$0x1] }
 0x28f   : > { %1785 = vmatpush3.msra.mxu1 %v1120_v53  ;;  %1751 = vmatprep.subr.mxu0 %v1103_v54  ;;  %v1075_v43 = vld [vmem:[%s3319_s5 + $0x200] sm:$0xff]  ;;  %v1001_v47 = vmax.f32 %v999_v41, %v1000_v42  ;;  %v1434_v51 = vld [vmem:[%s3321_s7 + $0x68] sm:$0xff]  ;;  %v1432_v53 = vld [vmem:[%s3321_s7 + $0x58] sm:$0xff] }
 0x290   : > { %1786 = vmatprep.subr.mxu1 %v1135_v55  ;;  %1752 = vmatpush3.msra.mxu0 %v1087_v56  ;;  %v1006_v45 = vld [vmem:[#allocation4 + $0xd] sm:$0x1]  ;;  %v1431_v54 = vld [vmem:[%s3321_s7 + $0x50] sm:$0xff]  ;;  %v1430_v55 = vld [vmem:[%s3321_s7 + $0x48] sm:$0xff] }
 0x291   : > { %1787 = vmatpush3.msra.mxu1 %v1119_v57  ;;  %1753 = vmatprep.subr.mxu0 %v1102_v58  ;;  %v1107_v46 = vld [vmem:[%s3319_s5 + $0x300] sm:$0xff]  ;;  %v1007_v48 = vmax.f32 %v1005_v44, %v1006_v45  ;;  %v1428_v57 = vld [vmem:[%s3321_s7 + $0x38] sm:$0xff]  ;;  %v1427_v58 = vld [vmem:[%s3321_s7 + $0x30] sm:$0xff] }
 0x292   : > { %1788 = vmatprep.subr.mxu1 %v1134_v59  ;;  %1754 = vmatpush3.msra.mxu0 %v1086_v60  ;;  %v1433_v52 = vld [vmem:[%s3321_s7 + $0x60] sm:$0xff]  ;;  %v1426_v59 = vld [vmem:[%s3321_s7 + $0x28] sm:$0xff] }
 0x293   : > { %1789 = vmatpush3.msra.mxu1 %v1118_v61  ;;  %1755 = vmatprep.subr.mxu0 %v1101_v62  ;;  %v1429_v56 = vld [vmem:[%s3321_s7 + $0x40] sm:$0xff]  ;;  %v1424_v61 = vld [vmem:[%s3321_s7 + $0x18] sm:$0xff]  ;;  %v1423_v62 = vld [vmem:[%s3321_s7 + $0x10] sm:$0xff] }
 0x294   : > { %1790 = vmatprep.subr.mxu1 %v1133_v63  ;;  %1756 = vmatpush3.msra.mxu0 %v1085_v0  ;;  %v1425_v60 = vld [vmem:[%s3321_s7 + $0x20] sm:$0xff]  ;;  %v1422_v63 = vld [vmem:[%s3321_s7 + $0x8] sm:$0xff] }
 0x295   : > { %1791 = vmatpush3.msra.mxu1 %v1117_v1  ;;  %1757 = vmatprep.subr.mxu0 %v1100_v2  ;;  %v1421_v0 = vld [vmem:[%s3321_s7] sm:$0xff]  ;;  %v1524_v1 = vld [vmem:[%s3323_s9 + $0x78] sm:$0xff]  ;;  %v1523_v2 = vld [vmem:[%s3323_s9 + $0x70] sm:$0xff] }
 0x296   : > { %1792 = vmatprep.subr.mxu1 %v1132_v3  ;;  %1758 = vmatpush3.msra.mxu0 %v1084_v5  ;;  %v1522_v3 = vld [vmem:[%s3323_s9 + $0x68] sm:$0xff]  ;;  %v1521_v5 = vld [vmem:[%s3323_s9 + $0x60] sm:$0xff] }
 0x297   : > { %1793 = vmatpush3.msra.mxu1 %v1116_v6  ;;  %1759 = vmatprep.subr.mxu0 %v1099_v7  ;;  %v1520_v6 = vld [vmem:[%s3323_s9 + $0x58] sm:$0xff]  ;;  %v1519_v7 = vld [vmem:[%s3323_s9 + $0x50] sm:$0xff]  ;;  %v1525_v41 = vld [vmem:[%s3324_s10] sm:$0x1] }
 0x298   : > { %1794 = vmatprep.subr.mxu1 %v1131_v8  ;;  %1760 = vmatpush3.msra.mxu0 %v1083_v9  ;;  %v1518_v8 = vld [vmem:[%s3323_s9 + $0x48] sm:$0xff]  ;;  %v1517_v9 = vld [vmem:[%s3323_s9 + $0x40] sm:$0xff] }
 0x299   : > { %1795 = vmatpush3.msra.mxu1 %v1115_v10  ;;  %1761 = vmatprep.subr.mxu0 %v1098_v11  ;;  %v1516_v10 = vld [vmem:[%s3323_s9 + $0x38] sm:$0xff]  ;;  %v1515_v11 = vld [vmem:[%s3323_s9 + $0x30] sm:$0xff] }
 0x29a   : > { %1796 = vmatprep.subr.mxu1 %v1130_v12  ;;  %1762 = vmatpush3.msra.mxu0 %v1082_v13  ;;  %v1514_v12 = vld [vmem:[%s3323_s9 + $0x28] sm:$0xff]  ;;  %v1513_v13 = vld [vmem:[%s3323_s9 + $0x20] sm:$0xff] }
 0x29b   : > { %1797 = vmatpush3.msra.mxu1 %v1114_v14  ;;  %1763 = vmatprep.subr.mxu0 %v1097_v15  ;;  %v1512_v14 = vld [vmem:[%s3323_s9 + $0x18] sm:$0xff] }
 0x29c   : > { %1798 = vmatprep.subr.mxu1 %v1129_v16  ;;  %1764 = vmatpush3.msra.mxu0 %v1081_v17 }
 0x29d   : > { %1799 = vmatpush3.msra.mxu1 %v1113_v18  ;;  %1765 = vmatprep.subr.mxu0 %v1096_v19  ;;  %v1139_v19 = vld [vmem:[%s3320_s6] sm:$0x1] }
 0x29e   : > { %1800 = vmatprep.subr.mxu1 %v1128_v20  ;;  %1766 = vmatpush3.msra.mxu0 %v1080_v21 }
 0x29f   : > { %1801 = vmatpush3.msra.mxu1 %v1112_v22  ;;  %1767 = vmatprep.subr.mxu0 %v1095_v23 }
 0x2a0   : > { %1802 = vmatprep.subr.mxu1 %v1127_v24  ;;  %1768 = vmatpush3.msra.mxu0 %v1079_v25 }
 0x2a1   : > { %1803 = vmatpush3.msra.mxu1 %v1111_v26  ;;  %1769 = vmatprep.subr.mxu0 %v1094_v27 }
 0x2a2   : > { %1804 = vmatprep.subr.mxu1 %v1126_v28  ;;  %1770 = vmatpush3.msra.mxu0 %v1078_v29 }
 0x2a3   : > { %1805 = vmatpush3.msra.mxu1 %v1110_v30  ;;  %1771 = vmatprep.subr.mxu0 %v1093_v31 }
 0x2a4   : > { %1806 = vmatprep.subr.mxu1 %v1125_v32  ;;  %1772 = vmatpush3.msra.mxu0 %v1077_v33  ;;  %v1511_v33 = vld [vmem:[%s3323_s9 + $0x10] sm:$0xff] }
 0x2a5   : > { %1807 = vmatpush3.msra.mxu1 %v1109_v34  ;;  %1773 = vmatprep.subr.mxu0 %v1092_v35  ;;  %v1510_v34 = vld [vmem:[%s3323_s9 + $0x8] sm:$0xff]  ;;  %v1509_v35 = vld [vmem:[%s3323_s9] sm:$0xff] }
 0x2a6   : > { %1808 = vmatprep.subr.mxu1 %v1124_v36  ;;  %1774 = vmatpush3.msra.mxu0 %v1076_v37  ;;  %v1437_v36 = vld [vmem:[%s3322_s8] sm:$0x1] }
 0x2a7   : > { %1809 = vmatpush3.msra.mxu1 %v1108_v38  ;;  %1775 = vmatprep.subr.mxu0 %v1091_v39 }
 0x2a8   : > { %1810 = vmatprep.subr.mxu1 %v1123_v40  ;;  %1776 = vmatpush3.msra.mxu0 %v1075_v43 }
 0x2a9   : > { %1811 = vmatpush3.msra.mxu1 %v1107_v46  ;;  %1345 = vmatmul.mubr.f32.vlgmr.msra.gmra.mxu0 %v1001_v47 }
 0x2aa   : > { %1415 = vmatmul.mubr.f32.vlgmr.msra.gmra.mxu1 %v1007_v48  ;;  %1849 = vmatprep.subr.mxu0 %v2024_v4 }
 0x2ab   : > { %1884 = vmatprep.subr.mxu1 %v2024_v4  ;;  %1850 = vmatpush3.msra.mxu0 %v1436_v49 }
 0x2ac   : > { %1851 = vmatprep.subr.mxu0 %v2024_v4  ;;  %1881 = vmatprep.mubr.msk.f32.mxu0 %vm2026_vm1, %v2024_v4 }
 0x2ad   : > { %1852 = vmatpush3.msra.mxu0 %v1435_v50  ;;  %1916 = vmatprep.mubr.msk.f32.mxu1 %vm2026_vm1, %v2024_v4 }
 0x2ae   : > { %1853 = vmatprep.subr.mxu0 %v2024_v4  ;;  %1885 = vmatpush3.msra.mxu1 %v1524_v1 }
 0x2af   : > { %1854 = vmatpush3.msra.mxu0 %v1434_v51  ;;  %1886 = vmatprep.subr.mxu1 %v2024_v4 }
 0x2b0   : > { %1855 = vmatprep.subr.mxu0 %v2024_v4  ;;  %1887 = vmatpush3.msra.mxu1 %v1523_v2 }
 0x2b1   : > { %1856 = vmatpush3.msra.mxu0 %v1433_v52  ;;  %1888 = vmatprep.subr.mxu1 %v2024_v4 }
 0x2b2   : > { %1857 = vmatprep.subr.mxu0 %v2024_v4  ;;  %1889 = vmatpush3.msra.mxu1 %v1522_v3 }
 0x2b3   : > { %1858 = vmatpush3.msra.mxu0 %v1432_v53  ;;  %1890 = vmatprep.subr.mxu1 %v2024_v4 }
 0x2b4   : > { %1859 = vmatprep.subr.mxu0 %v2024_v4  ;;  %1891 = vmatpush3.msra.mxu1 %v1521_v5 }
 0x2b5   : > { %1860 = vmatpush3.msra.mxu0 %v1431_v54  ;;  %1892 = vmatprep.subr.mxu1 %v2024_v4 }
 0x2b6   : > { %1861 = vmatprep.subr.mxu0 %v2024_v4  ;;  %1893 = vmatpush3.msra.mxu1 %v1520_v6 }
 0x2b7   : > { %1862 = vmatpush3.msra.mxu0 %v1430_v55  ;;  %1894 = vmatprep.subr.mxu1 %v2024_v4 }
 0x2b8   : > { %1863 = vmatprep.subr.mxu0 %v2024_v4  ;;  %1895 = vmatpush3.msra.mxu1 %v1519_v7 }
 0x2b9   : > { %1864 = vmatpush3.msra.mxu0 %v1429_v56  ;;  %1896 = vmatprep.subr.mxu1 %v2024_v4 }
 0x2ba   : > { %1865 = vmatprep.subr.mxu0 %v2024_v4  ;;  %1897 = vmatpush3.msra.mxu1 %v1518_v8 }
 0x2bb   : > { %1866 = vmatpush3.msra.mxu0 %v1428_v57  ;;  %1898 = vmatprep.subr.mxu1 %v2024_v4 }
 0x2bc   : > { %1867 = vmatprep.subr.mxu0 %v2024_v4  ;;  %1899 = vmatpush3.msra.mxu1 %v1517_v9 }
 0x2bd   : > { %1868 = vmatpush3.msra.mxu0 %v1427_v58  ;;  %1900 = vmatprep.subr.mxu1 %v2024_v4 }
 0x2be   : > { %1869 = vmatprep.subr.mxu0 %v2024_v4  ;;  %1901 = vmatpush3.msra.mxu1 %v1516_v10 }
 0x2bf   : > { %1870 = vmatpush3.msra.mxu0 %v1426_v59  ;;  %1902 = vmatprep.subr.mxu1 %v2024_v4 }
 0x2c0   : > { %1871 = vmatprep.subr.mxu0 %v2024_v4  ;;  %1903 = vmatpush3.msra.mxu1 %v1515_v11 }
 0x2c1   : > { %1872 = vmatpush3.msra.mxu0 %v1425_v60  ;;  %1904 = vmatprep.subr.mxu1 %v2024_v4 }
 0x2c2   : > { %1873 = vmatprep.subr.mxu0 %v2024_v4  ;;  %1905 = vmatpush3.msra.mxu1 %v1514_v12 }
 0x2c3   : > { %1874 = vmatpush3.msra.mxu0 %v1424_v61  ;;  %1906 = vmatprep.subr.mxu1 %v2024_v4 }
 0x2c4   : > { %1875 = vmatprep.subr.mxu0 %v2024_v4  ;;  %1907 = vmatpush3.msra.mxu1 %v1513_v13 }
 0x2c5   : > { %1876 = vmatpush3.msra.mxu0 %v1423_v62  ;;  %1908 = vmatprep.subr.mxu1 %v2024_v4 }
 0x2c6   : > { %1877 = vmatprep.subr.mxu0 %v2024_v4  ;;  %1909 = vmatpush3.msra.mxu1 %v1512_v14 }
 0x2c7   : > { %1878 = vmatpush3.msra.mxu0 %v1422_v63  ;;  %1910 = vmatprep.subr.mxu1 %v2024_v4 }
 0x2c8   : > { %1879 = vmatprep.subr.mxu0 %v2024_v4  ;;  %1911 = vmatpush3.msra.mxu1 %v1511_v33 }
 0x2c9   : > { %1880 = vmatpush3.msra.mxu0 %v1421_v0  ;;  %1912 = vmatprep.subr.mxu1 %v2024_v4 }
 0x2ca   : > { %1913 = vmatpush3.msra.mxu1 %v1510_v34 }
 0x2cb   : > { %1914 = vmatprep.subr.mxu1 %v2024_v4 }
 0x2cc   : > { %1915 = vmatpush3.msra.mxu1 %v1509_v35 }
 0x348   : > { %v1707_v15 = vpop.f32.mrf.mxu0 }
 0x349   : > { %v1742_v17 = vpop.f32.mrf.mxu1 }
 0x34a   : > { %v1708_v16 = vpop.f32.mrf.mxu0 }
 0x34b   : > { %v1709_v18 = vadd.f32 %v1708_v16, %v1707_v15  ;;  %v1743_v20 = vpop.f32.mrf.mxu1 }
 0x34c   : > { %v1744_v23 = vadd.f32 %v1743_v20, %v1742_v17 }
 0x34d   : > { %v1207_v21 = vadd.f32 %v1709_v18, %v1139_v19 }
 0x34f   : > { %v1277_v26 = vadd.f32 %v1744_v23, %v1207_v21 }
 0x369   : > { %v1777_v22 = vpop.f32.mrf.mxu0 }
 0x36a   : > { %v1812_v24 = vpop.f32.mrf.mxu1 }
 0x36b   : > { %v1778_v25 = vpop.f32.mrf.mxu0 }
 0x36c   : > { %v1779_v27 = vadd.f32 %v1778_v25, %v1777_v22  ;;  %v1813_v28 = vpop.f32.mrf.mxu1 }
 0x36d   : > { %v1814_v30 = vadd.f32 %v1813_v28, %v1812_v24 }
 0x36e   : > { %v1347_v29 = vadd.f32 %v1779_v27, %v1277_v26 }
 0x370   : > { %v1417_v31 = vadd.f32 %v1814_v30, %v1347_v29 }
 0x372   : > { %v1420_v32 = vmax.f32 %v1417_v31, 0.0 }
 0x374   : > { %1882 = vmatmul.mubr.f32.vlgmr.msra.gmra.mxu0 %v1420_v32 }
 0x434   : > { %v1504_v37 = vpop.f32.mrf.mxu0 }
 0x435   : > { %v1505_v38 = vadd.f32 %v1504_v37, %v1437_v36 }
 0x436   : > { %v1883_v39 = vpop.f32.mrf.mxu0 }
 0x437   : > { %v1508_v40 = vmax.f32 %v1505_v38, 0.0 }
 0x439   : > { %1917 = vmatmul.mubr.f32.vlgmr.msra.gmra.mxu1 %v1508_v40 }
 0x4f9   : > { %v1592_v4 = vpop.f32.mrf.mxu1 }
 0x4fa   : > { %v1593_v42 = vadd.f32 %v1592_v4, %v1525_v41 }
 0x4fb   : > { %v1918_v43 = vpop.f32.mrf.mxu1 }
 0x4fc   : > { %1596 = vst [vmem:[%s378_s24] sm:$0x1] %v1593_v42 }
 0x4fd   : > { %1975 = shalt.err (!%p1972_p3)
}
 0x4fe   : > { %s1976_s13 = scalar_lea.hbm %s3279_s25, 16  ;;  %s1980_s16 = scalar_lea.hbm %s3325_s11, 32 }
 0x4ff   : > { %p1977_p4 = scmp.ne.s32.totalorder %s3279_s25, %s1976_s13  ;;  %p1981_p9 = scmp.lt.s32.totalorder %s3279_s25, %s3325_s11 }
 0x500   : > { %p1982_p10 = scmp.lt.s32.totalorder %s1980_s16, %s1976_s13 }
 0x501   : > { %p1978_p7 = pnand %p1977_p4, %p2126_p5 }
 0x502   : > { %p1983_p11 = por %p1982_p10, %p1981_p9 }
 0x503   : > { %p1979_p8 = pneg %p1978_p7 }
 0x505   : > { %p1984_p12 = pnand %p1983_p11, %p1979_p8 }
 0x507   : > { %1987 = shalt.err (!%p1984_p12)
}
 0x508   : > { %1920 = dma.vmem_to_hbm [thread:$0]  (%p2126_p5), %s1611_s14, 16, %s3279_s25, %s1598_s26  }
 0x509 PF: > { %p1926_p13 = scmp.ge.s32.totalorder %s2022_s20, 2  ;;  %s1622_s29 = sand.u32 1, %s2010_s17  }
 0x50a   : > { %s1623_s21 = scalar_lea.sflag [#allocation6], %s1622_s29 }
 0x50b   : > { %p1923_p0 = pnand %p1926_p13, %p2130_p6 }
 0x50d   : > { %p1924_p1 = pneg %p1923_p0 }
 0x50f   : > { %2005 = dma.done.wait (%p1924_p1), %s1623_s21, 16  }
 0x510   : > { %2007 = vsyncadd (%p1924_p1), %s1623_s21, 4294967280  ;;  %s3329_s12 = sld [smem:[#allocation8_spill]]  ;;  %p21_p2 = scmp.ge.s32.totalorder %s2113_s23, 4  }
 0x511   : > { %s3330_s17 = smov %s2014_s18  ;;  %s3331_s18 = smov %s2018_s19 }
 0x512   : > { %s3333_s20 = smov %s2113_s23  ;;  %23 = sbr.rel (!%p21_p2) target bundleno = 3 (0x3), region = 102 }
 0x516   : > { %s3332_s19 = smov %s3329_s12 }
 0x517   :  { %1627 = vsyncpa [#allocation6], 1 }
 0x518   :  { %1629 = vsyncpa [#allocation6 + $0x1], 1 }

</bundles_post_ra>
